<compile_context>
chip_gen: v5e
topology: v5e:2x2
jax: 0.10.0
libtpu: 0.0.40
codegen_flags: <defaults>
</compile_context>

<pallas_src>
import math
import jax
import jax.numpy as jnp
from jax.experimental import pallas as pl
from jax.experimental.pallas import tpu as pltpu


def _round_up(a, b):
    return (a + b - 1) // b * b


# ----------------------------------------------------------------------------- kernel
def _gated_equivariant_kernel(
    x_ref, v_ref,                      # (tn, H) f32, (3, tn, H) f32
    w1_ref, w2_ref,                    # (H, H), (H, O)          matmul dtype
    wu1x_ref, wu1v_ref, bu1_ref,       # (H, I), (H, I), (1, I)  (bias f32)
    wu2_ref, bu2_ref,                  # (I, 2O), (1, 2O)        (bias f32)
    o_ref,                             # (tn, W) packed output slab
):
    tn, H = x_ref.shape
    O = w2_ref.shape[-1]
    W = o_ref.shape[-1]
    md = w1_ref.dtype                  # matmul dtype (bf16 by default)

    def mm(a, b):
        return jnp.dot(a, b, preferred_element_type=jnp.float32)

    # --- vector projections: fold xyz into ONE lane-aligned GEMM pair ---------
    # (3, tn, H) -> (3*tn, H): leading-dim collapse; tn is a multiple of 16 and
    # the minor two dims are unchanged, so the tiled layout is preserved (no copy).
    v_flat = v_ref[...].reshape(3 * tn, H).astype(md)
    b1 = mm(v_flat, w1_ref[...])       # (3*tn, H) f32  vec1_proj
    vec2 = mm(v_flat, w2_ref[...])     # (3*tn, O) f32  vec2_proj

    # per-atom L2 norm over xyz; square the three sublane-aligned row groups
    # directly (no (3*tn, H) squared intermediate kept live).
    bx, by, bz = b1[0:tn], b1[tn:2 * tn], b1[2 * tn:3 * tn]
    vec1 = jnp.sqrt(bx * bx + by * by + bz * bz)            # (tn, H) f32

    # --- update_net: Linear -> SiLU -> Linear ---------------------------------
    # cat([x, vec1]) folded into two K=H matmuls accumulated in f32.
    h = (mm(x_ref[...].astype(md), wu1x_ref[...])
         + mm(vec1.astype(md), wu1v_ref[...])
         + bu1_ref[...])                                     # (tn, I) f32
    h = h * jax.nn.sigmoid(h)                                # SiLU in f32 (EUP)
    # single (I, 2O) matmul (better lane fill when O < 128), then static slices.
    o = mm(h.astype(md), wu2_ref[...]) + bu2_ref[...]        # (tn, 2O) f32
    x_out = o[:, :O]
    gate = o[:, O:]

    # --- packed lane-dense output slab: [x_out | g*v_x | g*v_y | g*v_z | 0] ---
    parts = [x_out,
             gate * vec2[0:tn],
             gate * vec2[tn:2 * tn],
             gate * vec2[2 * tn:3 * tn]]
    if W > 4 * O:
        parts.append(jnp.zeros((tn, W - 4 * O), jnp.float32))
    o_ref[...] = jnp.concatenate(parts, axis=-1).astype(o_ref.dtype)


# ----------------------------------------------------------------------------- wrapper
def _pick_tile_n(N, H, I, O, W, vmem_budget_bytes, md_bytes, out_bytes):
    """Choose tile_n from a VMEM budget (conservative: weights counted double-
    buffered so the Buffered(1) fallback path also fits)."""
    weights = 2 * ((H * H + H * O + 2 * H * I + I * 2 * O) * md_bytes
                   + (I + 2 * O) * 4)
    # per-row VMEM: double-buffered f32 input blocks, double-buffered output slab,
    # plus a rough estimate of the f32 intermediates (b1, vec2, vec1, h, o, g*v).
    per_row = (2 * H * 4 + 2 * 3 * H * 4 + 2 * W * out_bytes
               + 4 * (3 * H + 3 * O + H + I + 2 * O + 3 * O))
    avail = vmem_budget_bytes - weights - (4 << 20)          # 4 MiB Mosaic slack
    t = max(16, int(avail // per_row))
    t = min(t, 1024)                                         # sweep point 512-1024
    t = max(16, (t // 16) * 16)
    t = min(t, _round_up(N, 16))
    # prefer >= 2 grid steps (v7x megacore sharding + pipeline overlap) when possible
    if t >= N and N > 16:
        t = max(16, _round_up((N + 1) // 2, 16))
    return t


def _forward_slab(x, v3, params, *, tile_n, matmul_dtype, out_dtype, vmem_budget_bytes):
    """Core pallas_call. x: (N, H), v3: (3, N, H) xyz-leading. Returns (N, W) slab."""
    N, H = x.shape
    assert v3.shape == (3, N, H)
    O = params["w2"].shape[1]
    I = params["wu1"].shape[1]
    md = matmul_dtype
    f32 = jnp.float32
    W = 4 * O if 4 * O >= 128 else 128                       # lane-dense slab width

    md_bytes = jnp.dtype(md).itemsize
    out_bytes = jnp.dtype(out_dtype).itemsize
    if tile_n is None:
        tile_n = _pick_tile_n(N, H, I, O, W, vmem_budget_bytes, md_bytes, out_bytes)
    tile_n = max(16, _round_up(int(tile_n), 16))
    n_pad = _round_up(N, tile_n)                             # output padded; inputs NOT padded
    grid = (n_pad // tile_n,)

    # weights cast once (grid-invariant, VMEM-resident); update_net[0] weight split
    # into the x / vec1 halves so the kernel never forms the lane concat.
    w1 = params["w1"].astype(md)                             # (H, H)
    w2 = params["w2"].astype(md)                             # (H, O)
    wu1x = params["wu1"][:H].astype(md)                      # (H, I)
    wu1v = params["wu1"][H:].astype(md)                      # (H, I)
    bu1 = params["bu1"].reshape(1, I).astype(f32)
    wu2 = params["wu2"].astype(md)                           # (I, 2O)
    bu2 = params["bu2"].reshape(1, 2 * O).astype(f32)

    def _const_spec(shape, pipeline_mode):
        nd = len(shape)
        idx = lambda i, _nd=nd: (0,) * _nd                   # grid-invariant block
        if pipeline_mode is None:
            return pl.BlockSpec(shape, idx)
        return pl.BlockSpec(shape, idx, pipeline_mode=pipeline_mode)

    def make_call(single_buffer_weights):
        wmode = pl.Buffered(1) if single_buffer_weights else None
        in_specs = [
            pl.BlockSpec((tile_n, H), lambda i: (i, 0)),         # x (f32, cast in-kernel)
            pl.BlockSpec((3, tile_n, H), lambda i: (0, i, 0)),   # v, xyz-leading
            _const_spec(w1.shape, wmode), _const_spec(w2.shape, wmode),
            _const_spec(wu1x.shape, wmode), _const_spec(wu1v.shape, wmode),
            _const_spec(bu1.shape, wmode),
            _const_spec(wu2.shape, wmode), _const_spec(bu2.shape, wmode),
        ]
        out_specs = pl.BlockSpec((tile_n, W), lambda i: (i, 0))
        return pl.pallas_call(
            _gated_equivariant_kernel,
            out_shape=jax.ShapeDtypeStruct((n_pad, W), out_dtype),
            grid_spec=pltpu.PrefetchScalarGridSpec(
                num_scalar_prefetch=0, grid=grid,
                in_specs=in_specs, out_specs=out_specs),
            compiler_params=pltpu.CompilerParams(
                dimension_semantics=("parallel",),
                vmem_limit_bytes=int(vmem_budget_bytes)),
        )

    args = (x, v3, w1, w2, wu1x, wu1v, bu1, wu2, bu2)
    try:
        slab = make_call(True)(*args)      # single-buffered resident weights
    except Exception:
        slab = make_call(False)(*args)     # fallback: default double-buffering
    return slab[:N]                        # padded rows (ragged-tail garbage) dropped


def gated_equivariant_block_xyz(x, v3, params, *, tile_n=None,
                                matmul_dtype=jnp.bfloat16, out_dtype=None,
                                vmem_budget_bytes=40 * 1024 * 1024):
    """xyz-leading interface: x (N, H), v3 (3, N, H) -> (x_out (N, O), v_out (3, N, O)).
    Use this end-to-end to avoid the (N,3,*) <-> (3,N,*) transpose HBM passes."""
    out_dtype = x.dtype if out_dtype is None else out_dtype
    O = params["w2"].shape[1]
    slab = _forward_slab(x, v3, params, tile_n=tile_n, matmul_dtype=matmul_dtype,
                         out_dtype=out_dtype, vmem_budget_bytes=vmem_budget_bytes)
    x_out = slab[:, :O]
    v_out = jnp.stack([slab[:, O:2 * O], slab[:, 2 * O:3 * O], slab[:, 3 * O:4 * O]], axis=0)
    return x_out, v_out


def gated_equivariant_block(x, v, params, **kwargs):
    """PyTorch-compatible interface: x (N, H), v (N, 3, H) -> ((N, O), (N, 3, O)).
    The two transposes are interface plumbing only; prefer the _xyz variant in a
    chained model."""
    v3 = jnp.transpose(v, (1, 0, 2))
    x_out, v3_out = gated_equivariant_block_xyz(x, v3, params, **kwargs)
    return x_out, jnp.transpose(v3_out, (1, 0, 2))


# ----------------------------------------------------------------------------- params / reference
def _xavier_uniform(key, fan_in, fan_out, dtype=jnp.float32):
    # matches torch.nn.init.xavier_uniform_ bound; stored as (in, out) so y = x @ W
    limit = math.sqrt(6.0 / (fan_in + fan_out))
    return jax.random.uniform(key, (fan_in, fan_out), dtype=dtype, minval=-limit, maxval=limit)


def init_params(key, hidden_channels, out_channels, intermediate_channels=None):
    if intermediate_channels is None:
        intermediate_channels = hidden_channels
    k1, k2, k3, k4 = jax.random.split(key, 4)
    H, O, I = hidden_channels, out_channels, intermediate_channels
    return {
        "w1": _xavier_uniform(k1, H, H),            # vec1_proj.weight^T
        "w2": _xavier_uniform(k2, H, O),            # vec2_proj.weight^T
        "wu1": _xavier_uniform(k3, 2 * H, I),       # update_net[0].weight^T
        "bu1": jnp.zeros((I,), jnp.float32),        # update_net[0].bias
        "wu2": _xavier_uniform(k4, I, 2 * O),       # update_net[2].weight^T
        "bu2": jnp.zeros((2 * O,), jnp.float32),    # update_net[2].bias
    }


def reference_jax(x, v, params, matmul_dtype=jnp.float32):
    """Plain-JAX reference mirroring the PyTorch forward; matmul_dtype lets us match
    the kernel's mixed precision (bf16 matmul inputs, f32 accumulation).
    Note: bf16 matmuls diverge slightly from a pure-f32 PyTorch reference."""
    c = lambda a: a.astype(matmul_dtype)
    f32 = jnp.float32
    vec1_buf = jnp.einsum("nah,hk->nak", c(v), c(params["w1"]),
                          preferred_element_type=f32)
    vec1 = jnp.sqrt(jnp.sum(vec1_buf * vec1_buf, axis=1))
    vec2 = jnp.einsum("nah,hk->nak", c(v), c(params["w2"]),
                      preferred_element_type=f32)
    xc = jnp.concatenate([c(x), c(vec1)], axis=-1)
    h = jnp.dot(xc, c(params["wu1"]), preferred_element_type=f32) + params["bu1"]
    h = h * jax.nn.sigmoid(h)
    o = jnp.dot(c(h), c(params["wu2"]), preferred_element_type=f32) + params["bu2"]
    O = params["w2"].shape[1]
    x_out, gate = o[:, :O], o[:, O:]
    v_out = gate[:, None, :] * vec2
    return x_out, v_out


if __name__ == "__main__":
    # small shapes; N not a multiple of the tile so the ragged tail + multi-step
    # ("parallel") grid paths are exercised. Auto tile_n picks 32 -> grid=(2,).
    N, H, O = 40, 32, 16   # atoms, hidden_channels, out_channels

    key = jax.random.PRNGKey(0)
    kx, kv, kp = jax.random.split(key, 3)
    x = jax.random.normal(kx, (N, H), dtype=jnp.float32)
    v = jax.random.normal(kv, (N, 3, H), dtype=jnp.float32)
    # include one atom with all-zero vector features (mask path of the reference;
    # forward value norm(0)=0 is identical — only the autograd mask differs).
    v = v.at[0].set(0.0)

    params = init_params(kp, H, O)

    x_out, v_out = gated_equivariant_block(x, v, params)
    jax.block_until_ready((x_out, v_out))

    # compare against a reference using the same bf16-matmul / f32-accumulate recipe
    x_ref, v_ref = reference_jax(x, v, params, matmul_dtype=jnp.bfloat16)
    assert x_out.shape == (N, O) and v_out.shape == (N, 3, O)
    assert jnp.allclose(x_out, x_ref, atol=1e-2, rtol=1e-2)
    assert jnp.allclose(v_out, v_ref, atol=1e-2, rtol=1e-2)

    print("KERNEL_OK")
</pallas_src>

<mosaic_0001>
module attributes {stable_mosaic.version = 11 : i64} {
  func.func @_gated_equivariant_kernel(%arg0: i32, %arg1: memref<32x32xf32, #tpu.memory_space<vmem>>, %arg2: memref<3x32x32xf32, #tpu.memory_space<vmem>>, %arg3: memref<32x32xbf16, #tpu.memory_space<vmem>>, %arg4: memref<32x16xbf16, #tpu.memory_space<vmem>>, %arg5: memref<32x32xbf16, #tpu.memory_space<vmem>>, %arg6: memref<32x32xbf16, #tpu.memory_space<vmem>>, %arg7: memref<1x32xf32, #tpu.memory_space<vmem>>, %arg8: memref<32x32xbf16, #tpu.memory_space<vmem>>, %arg9: memref<1x32xf32, #tpu.memory_space<vmem>>, %arg10: memref<32x128xf32, #tpu.memory_space<vmem>>) attributes {dimension_semantics = [#tpu.dimension_semantics<parallel>], iteration_bounds = array<i64: 2>, scalar_prefetch = 0 : i64, scratch_operands = 0 : i64, tpu.core_type = #tpu.core_type<tc>, window_params = [{transform_indices = @transform_0, window_bounds = array<i64: 32, 32>}, {transform_indices = @transform_1, window_bounds = array<i64: 3, 32, 32>}, {pipeline_mode = #tpu.pipeline_mode<synchronous>, transform_indices = @transform_2, window_bounds = array<i64: 32, 32>}, {pipeline_mode = #tpu.pipeline_mode<synchronous>, transform_indices = @transform_3, window_bounds = array<i64: 32, 16>}, {pipeline_mode = #tpu.pipeline_mode<synchronous>, transform_indices = @transform_4, window_bounds = array<i64: 32, 32>}, {pipeline_mode = #tpu.pipeline_mode<synchronous>, transform_indices = @transform_5, window_bounds = array<i64: 32, 32>}, {pipeline_mode = #tpu.pipeline_mode<synchronous>, transform_indices = @transform_6, window_bounds = array<i64: 1, 32>}, {pipeline_mode = #tpu.pipeline_mode<synchronous>, transform_indices = @transform_7, window_bounds = array<i64: 32, 32>}, {pipeline_mode = #tpu.pipeline_mode<synchronous>, transform_indices = @transform_8, window_bounds = array<i64: 1, 32>}, {transform_indices = @transform_9, window_bounds = array<i64: 32, 128>}]} {
    %c0 = arith.constant 0 : index
    %c0_0 = arith.constant 0 : index
    %c0_1 = arith.constant 0 : index
    %0 = vector.load %arg2[%c0, %c0_0, %c0_1] : memref<3x32x32xf32, #tpu.memory_space<vmem>>, vector<3x32x32xf32>
    %1 = vector.shape_cast %0 : vector<3x32x32xf32> to vector<96x32xf32>
    %2 = arith.truncf %1 : vector<96x32xf32> to vector<96x32xbf16>
    %c0_2 = arith.constant 0 : index
    %c0_3 = arith.constant 0 : index
    %3 = vector.load %arg3[%c0_2, %c0_3] : memref<32x32xbf16, #tpu.memory_space<vmem>>, vector<32x32xbf16>
    %cst = arith.constant dense<0.000000e+00> : vector<96x32xf32>
    %4 = tpu.matmul %2, %3, %cst {dimension_numbers = #tpu.dot_dimension_numbers<[1], [0], [0], [1], [0, 0, 1, 1], [], []>} : vector<96x32xbf16>, vector<32x32xbf16>, vector<96x32xf32> -> vector<96x32xf32>
    %c0_4 = arith.constant 0 : index
    %c0_5 = arith.constant 0 : index
    %5 = vector.load %arg4[%c0_4, %c0_5] : memref<32x16xbf16, #tpu.memory_space<vmem>>, vector<32x16xbf16>
    %cst_6 = arith.constant dense<0.000000e+00> : vector<96x16xf32>
    %6 = tpu.matmul %2, %5, %cst_6 {dimension_numbers = #tpu.dot_dimension_numbers<[1], [0], [0], [1], [0, 0, 1, 1], [], []>} : vector<96x32xbf16>, vector<32x16xbf16>, vector<96x16xf32> -> vector<96x16xf32>
    %7 = vector.extract_strided_slice %4 {offsets = [0, 0], sizes = [32, 32], strides = [1, 1]} : vector<96x32xf32> to vector<32x32xf32>
    %8 = vector.extract_strided_slice %4 {offsets = [32, 0], sizes = [32, 32], strides = [1, 1]} : vector<96x32xf32> to vector<32x32xf32>
    %9 = vector.extract_strided_slice %4 {offsets = [64, 0], sizes = [32, 32], strides = [1, 1]} : vector<96x32xf32> to vector<32x32xf32>
    %10 = arith.mulf %7, %7 : vector<32x32xf32>
    %11 = arith.mulf %8, %8 : vector<32x32xf32>
    %12 = arith.addf %10, %11 : vector<32x32xf32>
    %13 = arith.mulf %9, %9 : vector<32x32xf32>
    %14 = arith.addf %12, %13 : vector<32x32xf32>
    %15 = math.sqrt %14 : vector<32x32xf32>
    %c0_7 = arith.constant 0 : index
    %c0_8 = arith.constant 0 : index
    %16 = vector.load %arg1[%c0_7, %c0_8] : memref<32x32xf32, #tpu.memory_space<vmem>>, vector<32x32xf32>
    %17 = arith.truncf %16 : vector<32x32xf32> to vector<32x32xbf16>
    %c0_9 = arith.constant 0 : index
    %c0_10 = arith.constant 0 : index
    %18 = vector.load %arg5[%c0_9, %c0_10] : memref<32x32xbf16, #tpu.memory_space<vmem>>, vector<32x32xbf16>
    %cst_11 = arith.constant dense<0.000000e+00> : vector<32x32xf32>
    %19 = tpu.matmul %17, %18, %cst_11 {dimension_numbers = #tpu.dot_dimension_numbers<[1], [0], [0], [1], [0, 0, 1, 1], [], []>} : vector<32x32xbf16>, vector<32x32xbf16>, vector<32x32xf32> -> vector<32x32xf32>
    %20 = arith.truncf %15 : vector<32x32xf32> to vector<32x32xbf16>
    %c0_12 = arith.constant 0 : index
    %c0_13 = arith.constant 0 : index
    %21 = vector.load %arg6[%c0_12, %c0_13] : memref<32x32xbf16, #tpu.memory_space<vmem>>, vector<32x32xbf16>
    %cst_14 = arith.constant dense<0.000000e+00> : vector<32x32xf32>
    %22 = tpu.matmul %20, %21, %cst_14 {dimension_numbers = #tpu.dot_dimension_numbers<[1], [0], [0], [1], [0, 0, 1, 1], [], []>} : vector<32x32xbf16>, vector<32x32xbf16>, vector<32x32xf32> -> vector<32x32xf32>
    %23 = arith.addf %19, %22 : vector<32x32xf32>
    %c0_15 = arith.constant 0 : index
    %c0_16 = arith.constant 0 : index
    %24 = vector.load %arg7[%c0_15, %c0_16] : memref<1x32xf32, #tpu.memory_space<vmem>>, vector<1x32xf32>
    %25 = vector.broadcast %24 : vector<1x32xf32> to vector<32x32xf32>
    %26 = arith.addf %23, %25 : vector<32x32xf32>
    %27 = arith.negf %26 : vector<32x32xf32>
    %28 = math.exp %27 : vector<32x32xf32>
    %cst_17 = arith.constant 1.000000e+00 : f32
    %29 = vector.broadcast %cst_17 : f32 to vector<32x32xf32>
    %30 = arith.addf %29, %28 : vector<32x32xf32>
    %31 = arith.divf %29, %30 : vector<32x32xf32>
    %32 = arith.mulf %26, %31 : vector<32x32xf32>
    %33 = arith.truncf %32 : vector<32x32xf32> to vector<32x32xbf16>
    %c0_18 = arith.constant 0 : index
    %c0_19 = arith.constant 0 : index
    %34 = vector.load %arg8[%c0_18, %c0_19] : memref<32x32xbf16, #tpu.memory_space<vmem>>, vector<32x32xbf16>
    %cst_20 = arith.constant dense<0.000000e+00> : vector<32x32xf32>
    %35 = tpu.matmul %33, %34, %cst_20 {dimension_numbers = #tpu.dot_dimension_numbers<[1], [0], [0], [1], [0, 0, 1, 1], [], []>} : vector<32x32xbf16>, vector<32x32xbf16>, vector<32x32xf32> -> vector<32x32xf32>
    %c0_21 = arith.constant 0 : index
    %c0_22 = arith.constant 0 : index
    %36 = vector.load %arg9[%c0_21, %c0_22] : memref<1x32xf32, #tpu.memory_space<vmem>>, vector<1x32xf32>
    %37 = vector.broadcast %36 : vector<1x32xf32> to vector<32x32xf32>
    %38 = arith.addf %35, %37 : vector<32x32xf32>
    %39 = vector.extract_strided_slice %38 {offsets = [0, 0], sizes = [32, 16], strides = [1, 1]} : vector<32x32xf32> to vector<32x16xf32>
    %40 = vector.extract_strided_slice %38 {offsets = [0, 16], sizes = [32, 16], strides = [1, 1]} : vector<32x32xf32> to vector<32x16xf32>
    %41 = vector.extract_strided_slice %6 {offsets = [0, 0], sizes = [32, 16], strides = [1, 1]} : vector<96x16xf32> to vector<32x16xf32>
    %42 = arith.mulf %40, %41 : vector<32x16xf32>
    %43 = vector.extract_strided_slice %6 {offsets = [32, 0], sizes = [32, 16], strides = [1, 1]} : vector<96x16xf32> to vector<32x16xf32>
    %44 = arith.mulf %40, %43 : vector<32x16xf32>
    %45 = vector.extract_strided_slice %6 {offsets = [64, 0], sizes = [32, 16], strides = [1, 1]} : vector<96x16xf32> to vector<32x16xf32>
    %46 = arith.mulf %40, %45 : vector<32x16xf32>
    %cst_23 = arith.constant 0.000000e+00 : f32
    %47 = vector.broadcast %cst_23 : f32 to vector<32x64xf32>
    %48 = tpu.concatenate %39, %42, %44, %46, %47 in 1 : vector<32x16xf32>, vector<32x16xf32>, vector<32x16xf32>, vector<32x16xf32>, vector<32x64xf32> -> vector<32x128xf32>
    %c0_24 = arith.constant 0 : index
    %c0_25 = arith.constant 0 : index
    %49 = vector.load %arg10[%c0_24, %c0_25] : memref<32x128xf32, #tpu.memory_space<vmem>>, vector<32x128xf32>
    tpu.vector_store %arg10[%c0_24, %c0_25], %48 {strides = array<i32>} : memref<32x128xf32, #tpu.memory_space<vmem>>, vector<32x128xf32>,
    return
  }
  func.func @transform_0(%arg0: i32) -> (i32, i32) {
    %c0_i32 = arith.constant 0 : i32
    %c0_i32_0 = arith.constant 0 : i32
    return %arg0, %c0_i32 : i32, i32
  }
  func.func @transform_1(%arg0: i32) -> (i32, i32, i32) {
    %c0_i32 = arith.constant 0 : i32
    %c0_i32_0 = arith.constant 0 : i32
    %c0_i32_1 = arith.constant 0 : i32
    return %c0_i32, %arg0, %c0_i32_0 : i32, i32, i32
  }
  func.func @transform_2(%arg0: i32) -> (i32, i32) {
    %c0_i32 = arith.constant 0 : i32
    %c0_i32_0 = arith.constant 0 : i32
    %c0_i32_1 = arith.constant 0 : i32
    return %c0_i32, %c0_i32_0 : i32, i32
  }
  func.func @transform_3(%arg0: i32) -> (i32, i32) {
    %c0_i32 = arith.constant 0 : i32
    %c0_i32_0 = arith.constant 0 : i32
    %c0_i32_1 = arith.constant 0 : i32
    return %c0_i32, %c0_i32_0 : i32, i32
  }
  func.func @transform_4(%arg0: i32) -> (i32, i32) {
    %c0_i32 = arith.constant 0 : i32
    %c0_i32_0 = arith.constant 0 : i32
    %c0_i32_1 = arith.constant 0 : i32
    return %c0_i32, %c0_i32_0 : i32, i32
  }
  func.func @transform_5(%arg0: i32) -> (i32, i32) {
    %c0_i32 = arith.constant 0 : i32
    %c0_i32_0 = arith.constant 0 : i32
    %c0_i32_1 = arith.constant 0 : i32
    return %c0_i32, %c0_i32_0 : i32, i32
  }
  func.func @transform_6(%arg0: i32) -> (i32, i32) {
    %c0_i32 = arith.constant 0 : i32
    %c0_i32_0 = arith.constant 0 : i32
    %c0_i32_1 = arith.constant 0 : i32
    return %c0_i32, %c0_i32_0 : i32, i32
  }
  func.func @transform_7(%arg0: i32) -> (i32, i32) {
    %c0_i32 = arith.constant 0 : i32
    %c0_i32_0 = arith.constant 0 : i32
    %c0_i32_1 = arith.constant 0 : i32
    return %c0_i32, %c0_i32_0 : i32, i32
  }
  func.func @transform_8(%arg0: i32) -> (i32, i32) {
    %c0_i32 = arith.constant 0 : i32
    %c0_i32_0 = arith.constant 0 : i32
    %c0_i32_1 = arith.constant 0 : i32
    return %c0_i32, %c0_i32_0 : i32, i32
  }
  func.func @transform_9(%arg0: i32) -> (i32, i32) {
    %c0_i32 = arith.constant 0 : i32
    %c0_i32_0 = arith.constant 0 : i32
    return %arg0, %c0_i32 : i32, i32
  }
}

module attributes {stable_mosaic.version = 11 : i64} {
  func.func @_gated_equivariant_kernel(%arg0: i32, %arg1: memref<32x32xf32, #tpu.memory_space<vmem>>, %arg2: memref<3x32x32xf32, #tpu.memory_space<vmem>>, %arg3: memref<32x32xbf16, #tpu.memory_space<vmem>>, %arg4: memref<32x16xbf16, #tpu.memory_space<vmem>>, %arg5: memref<32x32xbf16, #tpu.memory_space<vmem>>, %arg6: memref<32x32xbf16, #tpu.memory_space<vmem>>, %arg7: memref<1x32xf32, #tpu.memory_space<vmem>>, %arg8: memref<32x32xbf16, #tpu.memory_space<vmem>>, %arg9: memref<1x32xf32, #tpu.memory_space<vmem>>, %arg10: memref<32x128xf32, #tpu.memory_space<vmem>>) attributes {dimension_semantics = [#tpu.dimension_semantics<parallel>], iteration_bounds = array<i64: 2>, scalar_prefetch = 0 : i64, scratch_operands = 0 : i64, tpu.core_type = #tpu.core_type<tc>, window_params = [{transform_indices = @transform_0, window_bounds = array<i64: 32, 32>}, {transform_indices = @transform_1, window_bounds = array<i64: 3, 32, 32>}, {pipeline_mode = #tpu.pipeline_mode<synchronous>, transform_indices = @transform_2, window_bounds = array<i64: 32, 32>}, {pipeline_mode = #tpu.pipeline_mode<synchronous>, transform_indices = @transform_3, window_bounds = array<i64: 32, 16>}, {pipeline_mode = #tpu.pipeline_mode<synchronous>, transform_indices = @transform_4, window_bounds = array<i64: 32, 32>}, {pipeline_mode = #tpu.pipeline_mode<synchronous>, transform_indices = @transform_5, window_bounds = array<i64: 32, 32>}, {pipeline_mode = #tpu.pipeline_mode<synchronous>, transform_indices = @transform_6, window_bounds = array<i64: 1, 32>}, {pipeline_mode = #tpu.pipeline_mode<synchronous>, transform_indices = @transform_7, window_bounds = array<i64: 32, 32>}, {pipeline_mode = #tpu.pipeline_mode<synchronous>, transform_indices = @transform_8, window_bounds = array<i64: 1, 32>}, {transform_indices = @transform_9, window_bounds = array<i64: 32, 128>}]} {
    %c0 = arith.constant 0 : index
    %c0_0 = arith.constant 0 : index
    %c0_1 = arith.constant 0 : index
    %0 = vector.load %arg2[%c0, %c0_0, %c0_1] : memref<3x32x32xf32, #tpu.memory_space<vmem>>, vector<3x32x32xf32>
    %1 = vector.shape_cast %0 : vector<3x32x32xf32> to vector<96x32xf32>
    %2 = arith.truncf %1 : vector<96x32xf32> to vector<96x32xbf16>
    %c0_2 = arith.constant 0 : index
    %c0_3 = arith.constant 0 : index
    %3 = vector.load %arg3[%c0_2, %c0_3] : memref<32x32xbf16, #tpu.memory_space<vmem>>, vector<32x32xbf16>
    %cst = arith.constant dense<0.000000e+00> : vector<96x32xf32>
    %4 = tpu.matmul %2, %3, %cst {dimension_numbers = #tpu.dot_dimension_numbers<[1], [0], [0], [1], [0, 0, 1, 1], [], []>} : vector<96x32xbf16>, vector<32x32xbf16>, vector<96x32xf32> -> vector<96x32xf32>
    %c0_4 = arith.constant 0 : index
    %c0_5 = arith.constant 0 : index
    %5 = vector.load %arg4[%c0_4, %c0_5] : memref<32x16xbf16, #tpu.memory_space<vmem>>, vector<32x16xbf16>
    %cst_6 = arith.constant dense<0.000000e+00> : vector<96x16xf32>
    %6 = tpu.matmul %2, %5, %cst_6 {dimension_numbers = #tpu.dot_dimension_numbers<[1], [0], [0], [1], [0, 0, 1, 1], [], []>} : vector<96x32xbf16>, vector<32x16xbf16>, vector<96x16xf32> -> vector<96x16xf32>
    %7 = vector.extract_strided_slice %4 {offsets = [0, 0], sizes = [32, 32], strides = [1, 1]} : vector<96x32xf32> to vector<32x32xf32>
    %8 = vector.extract_strided_slice %4 {offsets = [32, 0], sizes = [32, 32], strides = [1, 1]} : vector<96x32xf32> to vector<32x32xf32>
    %9 = vector.extract_strided_slice %4 {offsets = [64, 0], sizes = [32, 32], strides = [1, 1]} : vector<96x32xf32> to vector<32x32xf32>
    %10 = arith.mulf %7, %7 : vector<32x32xf32>
    %11 = arith.mulf %8, %8 : vector<32x32xf32>
    %12 = arith.addf %10, %11 : vector<32x32xf32>
    %13 = arith.mulf %9, %9 : vector<32x32xf32>
    %14 = arith.addf %12, %13 : vector<32x32xf32>
    %15 = math.sqrt %14 : vector<32x32xf32>
    %c0_7 = arith.constant 0 : index
    %c0_8 = arith.constant 0 : index
    %16 = vector.load %arg1[%c0_7, %c0_8] : memref<32x32xf32, #tpu.memory_space<vmem>>, vector<32x32xf32>
    %17 = arith.truncf %16 : vector<32x32xf32> to vector<32x32xbf16>
    %c0_9 = arith.constant 0 : index
    %c0_10 = arith.constant 0 : index
    %18 = vector.load %arg5[%c0_9, %c0_10] : memref<32x32xbf16, #tpu.memory_space<vmem>>, vector<32x32xbf16>
    %cst_11 = arith.constant dense<0.000000e+00> : vector<32x32xf32>
    %19 = tpu.matmul %17, %18, %cst_11 {dimension_numbers = #tpu.dot_dimension_numbers<[1], [0], [0], [1], [0, 0, 1, 1], [], []>} : vector<32x32xbf16>, vector<32x32xbf16>, vector<32x32xf32> -> vector<32x32xf32>
    %20 = arith.truncf %15 : vector<32x32xf32> to vector<32x32xbf16>
    %c0_12 = arith.constant 0 : index
    %c0_13 = arith.constant 0 : index
    %21 = vector.load %arg6[%c0_12, %c0_13] : memref<32x32xbf16, #tpu.memory_space<vmem>>, vector<32x32xbf16>
    %cst_14 = arith.constant dense<0.000000e+00> : vector<32x32xf32>
    %22 = tpu.matmul %20, %21, %cst_14 {dimension_numbers = #tpu.dot_dimension_numbers<[1], [0], [0], [1], [0, 0, 1, 1], [], []>} : vector<32x32xbf16>, vector<32x32xbf16>, vector<32x32xf32> -> vector<32x32xf32>
    %23 = arith.addf %19, %22 : vector<32x32xf32>
    %c0_15 = arith.constant 0 : index
    %c0_16 = arith.constant 0 : index
    %24 = vector.load %arg7[%c0_15, %c0_16] : memref<1x32xf32, #tpu.memory_space<vmem>>, vector<1x32xf32>
    %25 = vector.broadcast %24 : vector<1x32xf32> to vector<32x32xf32>
    %26 = arith.addf %23, %25 : vector<32x32xf32>
    %27 = arith.negf %26 : vector<32x32xf32>
    %28 = math.exp %27 : vector<32x32xf32>
    %cst_17 = arith.constant 1.000000e+00 : f32
    %29 = vector.broadcast %cst_17 : f32 to vector<32x32xf32>
    %30 = arith.addf %29, %28 : vector<32x32xf32>
    %31 = arith.divf %29, %30 : vector<32x32xf32>
    %32 = arith.mulf %26, %31 : vector<32x32xf32>
    %33 = arith.truncf %32 : vector<32x32xf32> to vector<32x32xbf16>
    %c0_18 = arith.constant 0 : index
    %c0_19 = arith.constant 0 : index
    %34 = vector.load %arg8[%c0_18, %c0_19] : memref<32x32xbf16, #tpu.memory_space<vmem>>, vector<32x32xbf16>
    %cst_20 = arith.constant dense<0.000000e+00> : vector<32x32xf32>
    %35 = tpu.matmul %33, %34, %cst_20 {dimension_numbers = #tpu.dot_dimension_numbers<[1], [0], [0], [1], [0, 0, 1, 1], [], []>} : vector<32x32xbf16>, vector<32x32xbf16>, vector<32x32xf32> -> vector<32x32xf32>
    %c0_21 = arith.constant 0 : index
    %c0_22 = arith.constant 0 : index
    %36 = vector.load %arg9[%c0_21, %c0_22] : memref<1x32xf32, #tpu.memory_space<vmem>>, vector<1x32xf32>
    %37 = vector.broadcast %36 : vector<1x32xf32> to vector<32x32xf32>
    %38 = arith.addf %35, %37 : vector<32x32xf32>
    %39 = vector.extract_strided_slice %38 {offsets = [0, 0], sizes = [32, 16], strides = [1, 1]} : vector<32x32xf32> to vector<32x16xf32>
    %40 = vector.extract_strided_slice %38 {offsets = [0, 16], sizes = [32, 16], strides = [1, 1]} : vector<32x32xf32> to vector<32x16xf32>
    %41 = vector.extract_strided_slice %6 {offsets = [0, 0], sizes = [32, 16], strides = [1, 1]} : vector<96x16xf32> to vector<32x16xf32>
    %42 = arith.mulf %40, %41 : vector<32x16xf32>
    %43 = vector.extract_strided_slice %6 {offsets = [32, 0], sizes = [32, 16], strides = [1, 1]} : vector<96x16xf32> to vector<32x16xf32>
    %44 = arith.mulf %40, %43 : vector<32x16xf32>
    %45 = vector.extract_strided_slice %6 {offsets = [64, 0], sizes = [32, 16], strides = [1, 1]} : vector<96x16xf32> to vector<32x16xf32>
    %46 = arith.mulf %40, %45 : vector<32x16xf32>
    %cst_23 = arith.constant 0.000000e+00 : f32
    %47 = vector.broadcast %cst_23 : f32 to vector<32x64xf32>
    %48 = tpu.concatenate %39, %42, %44, %46, %47 in 1 : vector<32x16xf32>, vector<32x16xf32>, vector<32x16xf32>, vector<32x16xf32>, vector<32x64xf32> -> vector<32x128xf32>
    %c0_24 = arith.constant 0 : index
    %c0_25 = arith.constant 0 : index
    %49 = vector.load %arg10[%c0_24, %c0_25] : memref<32x128xf32, #tpu.memory_space<vmem>>, vector<32x128xf32>
    tpu.vector_store %arg10[%c0_24, %c0_25], %48 {strides = array<i32>} : memref<32x128xf32, #tpu.memory_space<vmem>>, vector<32x128xf32>,
    return
  }
  func.func @transform_0(%arg0: i32) -> (i32, i32) {
    %c0_i32 = arith.constant 0 : i32
    %c0_i32_0 = arith.constant 0 : i32
    return %arg0, %c0_i32 : i32, i32
  }
  func.func @transform_1(%arg0: i32) -> (i32, i32, i32) {
    %c0_i32 = arith.constant 0 : i32
    %c0_i32_0 = arith.constant 0 : i32
    %c0_i32_1 = arith.constant 0 : i32
    return %c0_i32, %arg0, %c0_i32_0 : i32, i32, i32
  }
  func.func @transform_2(%arg0: i32) -> (i32, i32) {
    %c0_i32 = arith.constant 0 : i32
    %c0_i32_0 = arith.constant 0 : i32
    %c0_i32_1 = arith.constant 0 : i32
    return %c0_i32, %c0_i32_0 : i32, i32
  }
  func.func @transform_3(%arg0: i32) -> (i32, i32) {
    %c0_i32 = arith.constant 0 : i32
    %c0_i32_0 = arith.constant 0 : i32
    %c0_i32_1 = arith.constant 0 : i32
    return %c0_i32, %c0_i32_0 : i32, i32
  }
  func.func @transform_4(%arg0: i32) -> (i32, i32) {
    %c0_i32 = arith.constant 0 : i32
    %c0_i32_0 = arith.constant 0 : i32
    %c0_i32_1 = arith.constant 0 : i32
    return %c0_i32, %c0_i32_0 : i32, i32
  }
  func.func @transform_5(%arg0: i32) -> (i32, i32) {
    %c0_i32 = arith.constant 0 : i32
    %c0_i32_0 = arith.constant 0 : i32
    %c0_i32_1 = arith.constant 0 : i32
    return %c0_i32, %c0_i32_0 : i32, i32
  }
  func.func @transform_6(%arg0: i32) -> (i32, i32) {
    %c0_i32 = arith.constant 0 : i32
    %c0_i32_0 = arith.constant 0 : i32
    %c0_i32_1 = arith.constant 0 : i32
    return %c0_i32, %c0_i32_0 : i32, i32
  }
  func.func @transform_7(%arg0: i32) -> (i32, i32) {
    %c0_i32 = arith.constant 0 : i32
    %c0_i32_0 = arith.constant 0 : i32
    %c0_i32_1 = arith.constant 0 : i32
    return %c0_i32, %c0_i32_0 : i32, i32
  }
  func.func @transform_8(%arg0: i32) -> (i32, i32) {
    %c0_i32 = arith.constant 0 : i32
    %c0_i32_0 = arith.constant 0 : i32
    %c0_i32_1 = arith.constant 0 : i32
    return %c0_i32, %c0_i32_0 : i32, i32
  }
  func.func @transform_9(%arg0: i32) -> (i32, i32) {
    %c0_i32 = arith.constant 0 : i32
    %c0_i32_0 = arith.constant 0 : i32
    return %arg0, %c0_i32 : i32, i32
  }
}

</mosaic_0001>

<bundles_post_ra>
// kernel: tpu_custom_call.1
= control target key start
LH: loop header
LB: loop body
LE: loop exit
PB: predicated region body
PF: predicated region fallthrough
CT: control target
= control target key end

     0   :  { %s1943_s0 = inlined_call_operand.vmem [shape: f32[40,32], index: 0, kind: input, shape index: {}]   ;;  %s1944_s1 = inlined_call_operand.vmem [shape: f32[3,40,32], index: 1, kind: input, shape index: {}]   ;;  %s1945_s2 = inlined_call_operand.vmem [shape: bf16[32,32], index: 2, kind: input, shape index: {}]   ;;  %s1946_s3 = inlined_call_operand.vmem [shape: bf16[32,16], index: 3, kind: input, shape index: {}]   ;;  %s1947_s4 = inlined_call_operand.vmem [shape: bf16[32,32], index: 4, kind: input, shape index: {}]   ;;  %s1948_s5 = inlined_call_operand.vmem [shape: bf16[32,32], index: 5, kind: input, shape index: {}]   ;;  %s1949_s6 = inlined_call_operand.vmem [shape: f32[1,32], index: 6, kind: input, shape index: {}]   ;;  %s1950_s7 = inlined_call_operand.vmem [shape: bf16[32,32], index: 7, kind: input, shape index: {}]   ;;  %s1951_s8 = inlined_call_operand.vmem [shape: f32[1,32], index: 8, kind: input, shape index: {}]   ;;  %s1952_s9 = inlined_call_operand.hbm [shape: f32[64,128], index: 9, kind: output, shape index: {}]  }
   0x1   :  { %1954 = sst [smem:[#allocation8_spill]] %s1944_s1 }
   0x2   :  { %14 = vsyncpa [#allocation4], 0 }
   0x3   :  { %16 = vsyncpa [#allocation4 + $0x1], 0  ;;  %s1663_s30 = smov 0   ;;  %s1665_s10 = smov 0  }
   0x4   :  { %s1667_s11 = smov 0   ;;  %s1669_s12 = smov 0  }
   0x5 LB: > { %1955 = sst [smem:[#allocation6_spill]] %s1571_s11  ;;  %s1684_s13 = sadd.s32 4294967295, %s1575_s12   ;;  %s1575_s12 = sphi %s1669_s12, %s1970_s12   ;;  %s1571_s11 = sphi %s1667_s11, %s1967_s11   ;;  %s1567_s10 = sphi %s1665_s10, %s1969_s10   ;;  %s1563_s30 = sphi %s1663_s30, %s1968_s30  }
   0x6   : > { %s1241_s14 = sadd.s32 4294967294, %s1575_s12   ;;  %s1688_s15 = sadd.s32 1, %s1575_s12  }
   0x7   : > { %s55_s16 = sadd.s32 1, %s1571_s11  ;;  %s52_s17 = ssub.s32 %s1575_s12, %s1688_s15 }
   0x8   : > { %p62_p0 = scmp.ne.s32.totalorder %s1571_s11, %s1567_s10  ;;  %p53_p1 = scmp.eq.s32.totalorder %s52_s17, 0 }
   0x9   : > { %p63_p2 = scmp.eq.s32.totalorder %s1575_s12, 0  ;;  %p239_p3 = scmp.eq.s32.totalorder %s1684_s13, 1 }
   0xa   : > { %p244_p4 = scmp.ne.s32.totalorder %s1567_s10, %s1563_s30  ;;  %p245_p7 = scmp.eq.s32.totalorder %s1241_s14, 1 }
   0xb   : > { %s1700_s18 = scalar_select %p53_p1, %s1571_s11, %s55_s16  }
   0xc   : > { %p64_p5 = por %p63_p2, %p62_p0  ;;  %p1702_p6 = por %p239_p3, %p62_p0 }
   0xd   : > { %1956 = sst [smem:[#allocation7_spill]] %s1700_s18  ;;  %p1706_p8 = por %p245_p7, %p244_p4 }
   0xe   : > { %p1243_p9 = scmp.ge.s32.totalorder %s1575_s12, 2 }
  0x10   : > { %282 = sbr.rel (%p1243_p9) target bundleno = 71 (0x47), region = 44 }
  0x15   : > { %302 = sbr.rel (!%p64_p5) target bundleno = 71 (0x47), region = 52  ;;  %s304_s21 = sand.u32 (%p64_p5), 1, %s1571_s11  }
  0x16   : > { %s1244_s22 = sshll.u32 (%p64_p5), %s1575_s12, 2  ;;  %s1346_s23 = smul.u32 (%p64_p5), 96, %s304_s21 }
  0x17   : > { %s308_s24 = ssub.s32 (%p64_p5), 5, %s1244_s22  ;;  %s1328_s25 = sshll.u32 (%p64_p5), %s1575_s12, 5 }
  0x18   : > { %p309_p10 = scmp.lt.s32.totalorder (%p64_p5), %s308_s24, 4  ;;  %s1959_s1 = sld [smem:[#allocation8_spill]] (%p64_p5) }
  0x19   : > { %s1724_s14 = scalar_lea.vmem (%p64_p5), [#allocation2], %s1346_s23  }
  0x1a   : > { %s1972_s24 = smov (!%p309_p10, %s308_s24), 4 }
  0x1b   : > { %s311_s29 = smul.u32 24, %s1972_s24 }
  0x1d   : > { %p1247_p11 = scmp.eq.s32.totalorder %s311_s29, 0 }
  0x1e   : > { %s1719_s28 = scalar_lea.vmem %s1959_s1, %s1328_s25   ;;  %s1727_s16 = sshrl.u32 (!%p1247_p11), %s1972_s24, 2 }
  0x1f   : > { %317 = sbr.rel (%p1247_p11) target bundleno = 71 (0x47), region = 56  ;;  %p1248_p12 = scmp.le.s32.totalorder (!%p1247_p11), %s1727_s16, 0 }
  0x24   : > { %1191 = sbr.rel (%p1248_p12) target bundleno = 54 (0x36), region = 153  ;;  %s1960_s17 = smov (!%p1248_p12), %s1724_s14 }
  0x25   : > { %s1961_s21 = smov (!%p1248_p12), %s1719_s28  ;;  %s1736_s22 = smov (!%p1248_p12), 0  }
  0x26   : > { %s1738_s25 = smov (!%p1248_p12), 0  }
  0x29 LB: >> { %v406_v0 = vld [vmem:[%s1583_s21] sm:$0xff]  ;;  %v408_v1 = vld [vmem:[%s1583_s21 + $0x8] sm:$0xff]  ;;  %v410_v2 = vld [vmem:[%s1583_s21 + $0x10] sm:$0xff]  ;;  %s430_s23 = sadd.s32 1, %s1587_s22  ;;  %s400_s25 = sadd.s32 1, %s1591_s25   ;;  %s1591_s25 = sphi %s1738_s25, %s400_s25   ;;  %s1587_s22 = sphi %s1736_s22, %s1964_s22   ;;  %s1583_s21 = sphi %s1961_s21, %s1963_s21   ;;  %s1579_s17 = sphi %s1960_s17, %s1962_s17  }
  0x2a   : >> { %407 = vst [vmem:[%s1579_s17] sm:$0xff] %v406_v0  ;;  %v412_v3 = vld [vmem:[%s1583_s21 + $0x18] sm:$0xff]  ;;  %p431_p13 = scmp.ge.s32.totalorder %s430_s23, %s1727_s16  ;;  %v414_v4 = vld [vmem:[%s1583_s21 + $0x28] sm:$0xff]  ;;  %v416_v5 = vld [vmem:[%s1583_s21 + $0x30] sm:$0xff]  ;;  %p399_p0 = scmp.ge.s32.totalorder %s400_s25, %s1727_s16 }
  0x2b   : >> { %409 = vst [vmem:[%s1579_s17 + $0x8] sm:$0xff] %v408_v1  ;;  %v418_v6 = vld [vmem:[%s1583_s21 + $0x38] sm:$0xff]  ;;  %v420_v7 = vld [vmem:[%s1583_s21 + $0x40] sm:$0xff]  ;;  %v422_v8 = vld [vmem:[%s1583_s21 + $0x50] sm:$0xff] }
  0x2c   : >> { %411 = vst [vmem:[%s1579_s17 + $0x10] sm:$0xff] %v410_v2  ;;  %s1974_s23 = smov (%p431_p13, %s430_s23), 0  ;;  %v424_v9 = vld [vmem:[%s1583_s21 + $0x58] sm:$0xff]  ;;  %v426_v10 = vld [vmem:[%s1583_s21 + $0x60] sm:$0xff]  ;;  %v428_v11 = vld [vmem:[%s1583_s21 + $0x68] sm:$0xff] }
  0x2d   : >> { %413 = vst [vmem:[%s1579_s17 + $0x18] sm:$0xff] %v412_v3  ;;  %s1249_s26 = sshll.u32 %s1974_s23, 5  ;;  %s1964_s22 = smov %s1974_s23 }
  0x2e   : >> { %415 = vst [vmem:[%s1579_s17 + $0x20] sm:$0xff] %v414_v4  ;;  %s435_s27 = scalar_lea.vmem %s1719_s28, %s1249_s26   ;;  %s436_s29 = scalar_lea.vmem %s1724_s14, %s1249_s26 [#allocation2]  }
  0x2f   : >> { %417 = vst [vmem:[%s1579_s17 + $0x28] sm:$0xff] %v416_v5  ;;  %s1963_s21 = smov %s435_s27 }
  0x30   : >> { %419 = vst [vmem:[%s1579_s17 + $0x30] sm:$0xff] %v418_v6 }
  0x31   : >> { %421 = vst [vmem:[%s1579_s17 + $0x38] sm:$0xff] %v420_v7  ;;  %402 = sbr.rel (!%p399_p0) target bundleno = 41 (0x29), region = 159 }
  0x32   : >> { %423 = vst [vmem:[%s1579_s17 + $0x40] sm:$0xff] %v422_v8 }
  0x33   : >> { %425 = vst [vmem:[%s1579_s17 + $0x48] sm:$0xff] %v424_v9 }
  0x34   : >> { %427 = vst [vmem:[%s1579_s17 + $0x50] sm:$0xff] %v426_v10 }
  0x35   : >> { %429 = vst [vmem:[%s1579_s17 + $0x58] sm:$0xff] %v428_v11  ;;  %s1962_s17 = smov %s436_s29 }
  0x36 PF: > { %s1774_s26 = sand.u32 3, %s1972_s24   ;;  %s1329_s1 = sshll.u32 %s1727_s16, 5 }
  0x37   : > { %s1778_s18 = scalar_lea.vmem %s1719_s28, %s1329_s1   ;;  %s1781_s11 = scalar_lea.vmem %s1724_s14, %s1329_s1 [#allocation2]  }
  0x38   : > { %p1254_p1 = scmp.le.s32.totalorder %s1774_s26, 0 }
  0x39   : > { %s1965_s25 = smov (!%p1254_p1), %s1781_s11  ;;  %s1597_s23 = smov (!%p1254_p1), %s1778_s18  }
  0x3a   : > { %1205 = sbr.rel (%p1254_p1) target bundleno = 71 (0x47), region = 164  ;;  %s1601_s17 = smov (!%p1254_p1), 0  }
  0x3b   : > { %s1605_s21 = smov (!%p1254_p1), 0  }
  0x3f LB: >> { %v453_v12 = vld [vmem:[%s1599_s23] sm:$0xff]  ;;  %v455_v13 = vld [vmem:[%s1599_s23 + $0x28] sm:$0xff]  ;;  %v457_v14 = vld [vmem:[%s1599_s23 + $0x50] sm:$0xff]  ;;  %s459_s1 = sadd.s32 1, %s1603_s17  ;;  %s447_s21 = sadd.s32 1, %s1607_s21   ;;  %s1607_s21 = sphi %s1605_s21, %s447_s21   ;;  %s1603_s17 = sphi %s1601_s17, %s1602_s17   ;;  %s1599_s23 = sphi %s1597_s23, %s464_s23   ;;  %s1595_s25 = sphi %s1965_s25, %s465_s25  }
  0x40   : >> { %454 = vst [vmem:[%s1595_s25] sm:$0xff] %v453_v12  ;;  %p460_p2 = scmp.ge.s32.totalorder %s459_s1, %s1774_s26  ;;  %p446_p3 = scmp.ge.s32.totalorder %s447_s21, %s1774_s26 }
  0x41   : >> { %456 = vst [vmem:[%s1595_s25 + $0x20] sm:$0xff] %v455_v13 }
  0x42   : >> { %458 = vst [vmem:[%s1595_s25 + $0x40] sm:$0xff] %v457_v14  ;;  %s1976_s1 = smov (%p460_p2, %s459_s1), 0  ;;  %449 = sbr.rel (!%p446_p3) target bundleno = 63 (0x3f), region = 170 }
  0x43   : >> { %s1255_s24 = sshll.u32 %s1976_s1, 3  ;;  %s1602_s17 = smov %s1976_s1  }
  0x44   : >> { %s464_s23 = scalar_lea.vmem %s1778_s18, %s1255_s24   ;;  %s465_s25 = scalar_lea.vmem %s1781_s11, %s1255_s24 [#allocation2]  }
  0x47 PF: > { %p1257_p4 = scmp.ge.s32.totalorder %s1575_s12, 1  ;;  %p470_p5 = scmp.lt.s32.totalorder %s1575_s12, 3 }
  0x49   : > { %p471_p7 = pnand %p1257_p4, %p470_p5 }
  0x4a   : > { %s1801_s16 = sand.u32 (!%p471_p7), 1, %s1567_s10   ;;  %s1259_s17 = sshll.u32 (!%p471_p7), %s1684_s13, 2 }
  0x4b   : > { %474 = sbr.rel (%p471_p7) target bundleno = 778 (0x30a), region = 104  ;;  %p526_p10 = scmp.lt.s32.totalorder (!%p471_p7), %s1259_s17, 4 }
  0x4c   : > { %s1347_s22 = smul.u32 (!%p471_p7), 96, %s1801_s16  ;;  %s1609_s23 = smov (!%p471_p7), 16  }
  0x4d   : > { %s1610_s18 = smov (!%p471_p7), 32   ;;  %s1341_s26 = sshll.u32 (!%p471_p7), %s1684_s13, 5 }
  0x4e   : > { %s479_s27 = scalar_lea.vmem (!%p471_p7), [#allocation2], %s1347_s22  ;;  %s1098_s1 = scalar_lea.sflag (!%p471_p7), [#allocation4], %s1801_s16 }
  0x4f   : > { %s1501_s11 = scalar_lea.hbm (!%p471_p7), %s1952_s9, 64 }
  0x50   : > { %v1332_v15 = vld [vmem:[%s1945_s2 + $0x8] sm:$0xff]  ;;  %v1331_v16 = vld [vmem:[%s1945_s2] sm:$0xff]  ;;  %vm576_vm0 = vcmask 261120   ;;  %v552_v20 = vld [vmem:[%s479_s27 + $0x50] sm:$0xff]  ;;  %s1978_s17 = smov (!%p526_p10, %s1259_s17), 4 }
  0x51   : > { %601 = vmatpush.bf16.msra.mxu0 %v1332_v15  ;;  %1342 = vmatpush.bf16.msra.mxu3 %v1332_v15  ;;  %v542_v17 = vld [vmem:[%s479_s27] sm:$0xff]  ;;  %v543_v18 = vld [vmem:[%s479_s27 + $0x8] sm:$0xff]  ;;  %v553_v21 = vld [vmem:[%s479_s27 + $0x58] sm:$0xff]  ;;  %s1260_s21 = sshll.u32 %s1978_s17, 3  ;;  %s1109_s17 = scalar_lea.hbm %s1952_s9, %s1341_s26 }
  0x52   : > { %v554_v19 = vpack.c.bf16 %v543_v18, %v542_v17  ;;  %v559_v22 = vpack.c.bf16 %v553_v21, %v552_v20  ;;  %v544_v23 = vld [vmem:[%s479_s27 + $0x10] sm:$0xff]  ;;  %v545_v24 = vld [vmem:[%s479_s27 + $0x18] sm:$0xff]  ;;  %v546_v26 = vld [vmem:[%s479_s27 + $0x20] sm:$0xff]  ;;  %s1828_s28 = scalar_lea.vmem %s1943_s0, %s1260_s21  ;;  %s1112_s13 = sshll.u32 %s1109_s17, 4  ;;  %s1113_s13 = int_to_ptr.hbm [resolvable:$true] %s1112_s13 }
  0x53   : > { %v555_v25 = vpack.c.bf16 %v545_v24, %v544_v23  ;;  %v547_v27 = vld [vmem:[%s479_s27 + $0x28] sm:$0xff]  ;;  %v548_v29 = vld [vmem:[%s479_s27 + $0x30] sm:$0xff]  ;;  %v549_v30 = vld [vmem:[%s479_s27 + $0x38] sm:$0xff]  ;;  %s1495_s24 = sshra.s32 %s1113_s13, 4  ;;  %s1496_s24 = int_to_ptr.hbm [resolvable:$true] %s1495_s24 }
  0x54   : > { %v556_v28 = vpack.c.bf16 %v547_v27, %v546_v26  ;;  %v557_v31 = vpack.c.bf16 %v549_v30, %v548_v29  ;;  %v550_v32 = vld [vmem:[%s479_s27 + $0x40] sm:$0xff]  ;;  %v551_v33 = vld [vmem:[%s479_s27 + $0x48] sm:$0xff]  ;;  %v759_v4 = vld [vmem:[%s1828_s28 + $0x10] sm:$0xff]  ;;  %s1258_s27 = sshll.u32 %s1801_s16, 5  ;;  %p1502_p0 = scmp.lt.s32.totalorder %s1496_s24, %s1952_s9 }
  0x55   : > { %602 = vmatpush.bf16.msra.mxu0 %v1331_v16  ;;  %1343 = vmatpush.bf16.msra.mxu3 %v1331_v16  ;;  %v558_v34 = vpack.c.bf16 %v551_v33, %v550_v32  ;;  %v1334_v35 = vld [vmem:[%s1946_s3 + $0x8] sm:$0xff]  ;;  %v1333_v36 = vld [vmem:[%s1946_s3] sm:$0xff]  ;;  %v760_v5 = vld [vmem:[%s1828_s28 + $0x18] sm:$0xff]  ;;  %s520_s29 = scalar_lea.vmem [#allocation3], %s1258_s27 }
  0x56   : > { %656 = vmatpush.bf16.msra.mxu1 %v1334_v35  ;;  %v1336_v43 = vld [vmem:[%s1947_s4 + $0x8] sm:$0xff]  ;;  %v1335_v45 = vld [vmem:[%s1947_s4] sm:$0xff]  ;;  %v762_v7 = vpack.c.bf16 %v760_v5, %v759_v4  ;;  %s1110_s21 = sshll.u32 %s520_s29, 4  ;;  %s1111_s21 = int_to_ptr.vmem [resolvable:$true] %s1110_s21 }
  0x57   : > { %v1338_v44 = vld [vmem:[%s1948_s5 + $0x8] sm:$0xff]  ;;  %v757_v46 = vld [vmem:[%s1828_s28] sm:$0xff] }
  0x58   : > { %1269 = vmatmul.msk.bf16.vlgmr.msra.gmra.mxu0 %vm576_vm0, %v554_v19  ;;  %1274 = vmatmul.msk.bf16.vlgmr.msra.gmra.mxu3 %vm576_vm0, %v559_v22  ;;  %v758_v47 = vld [vmem:[%s1828_s28 + $0x8] sm:$0xff]  ;;  %v1337_v49 = vld [vmem:[%s1948_s5] sm:$0xff]  ;;  %s1497_s28 = scalar_lea.hbm %s1496_s24, 32 }
  0x59   : > { %1344 = vmatpush.bf16.msrb.mxu3 %v1334_v35  ;;  %797 = vmatpush.bf16.msra.mxu2 %v1338_v44  ;;  %v761_v50 = vpack.c.bf16 %v758_v47, %v757_v46  ;;  %p1498_p11 = scmp.ne.s32.totalorder %s1496_s24, %s1497_s28  ;;  %p1503_p1 = scmp.lt.s32.totalorder %s1501_s11, %s1497_s28 }
  0x5a   : > { %657 = vmatpush.bf16.msra.mxu1 %v1333_v36 }
  0x5b   : > { %p1499_p12 = pnand %p1498_p11, %p1702_p6  ;;  %p1504_p2 = por %p1503_p1, %p1502_p0 }
  0x5d   : > { %1345 = vmatpush.bf16.msrb.mxu3 %v1333_v36  ;;  %1283 = vmatmul.msk.bf16.vlgmr.msra.gmra.mxu1 %vm576_vm0, %v554_v19  ;;  %p1500_p13 = pneg %p1499_p12 }
  0x5e   : > { %798 = vmatpush.bf16.msra.mxu2 %v1337_v49 }
  0x5f   : > { %p1505_p3 = pnand %p1504_p2, %p1500_p13 }
  0x61   : > { %834 = vmatpush.bf16.msra.mxu3 %v1336_v43 }
  0x65   : > { %835 = vmatpush.bf16.msra.mxu3 %v1335_v45 }
  0x68   : > { %1270 = vmatmul.msk.bf16.gmra.mxu0 %vm576_vm0, %v555_v25  ;;  %1288 = vmatmul.msk.bf16.vlgmr.msrb.gmra.mxu3 %vm576_vm0, %v559_v22 }
  0x6d   : > { %1284 = vmatmul.msk.bf16.gmra.mxu1 %vm576_vm0, %v555_v25 }
  0x78   : > { %1271 = vmatmul.msk.bf16.gmra.mxu0 %vm576_vm0, %v556_v28  ;;  %1307 = vmatmul.msk.bf16.vlgmr.msra.gmra.mxu3 %vm576_vm0, %v761_v50 }
  0x7d   : > { %1285 = vmatmul.msk.bf16.gmra.mxu1 %vm576_vm0, %v556_v28 }
  0x88   : > { %1272 = vmatmul.msk.bf16.gmra.mxu0 %vm576_vm0, %v557_v31  ;;  %1308 = vmatmul.msk.bf16.gmra.mxu3 %vm576_vm0, %v762_v7 }
  0x8d   : > { %1286 = vmatmul.msk.bf16.gmra.mxu1 %vm576_vm0, %v557_v31 }
  0x98   : > { %1273 = vmatmul.msk.bf16.gmra.mxu0 %vm576_vm0, %v558_v34 }
  0x9d   : > { %1287 = vmatmul.msk.bf16.gmra.mxu1 %vm576_vm0, %v558_v34 }
  0xd5   : > { %v604_v37 = vpop.f32.mrf.mxu0 }
  0xd6   : > { %v689_v54 = vmul.f32 %v604_v37, %v604_v37 }
  0xdb   : > { %v629_v51 = vpop.f32.mrf.mxu3 }
  0xdc   : > { %v703_v3 = vmul.f32 %v629_v51, %v629_v51 }
  0xdd   : > { %v606_v38 = vpop.f32.mrf.mxu0 }
  0xde   : > { %v690_v8 = vmul.f32 %v606_v38, %v606_v38 }
  0xe3   : > { %v631_v57 = vpop.f32.mrf.mxu3 }
  0xe4   : > { %v704_v0 = vmul.f32 %v631_v57, %v631_v57  ;;  %v659_v57 = vpop.f32.mrf.mxu1 }
  0xe5   : > { %v609_v39 = vpop.f32.mrf.mxu0 }
  0xe6   : > { %v691_v62 = vmul.f32 %v609_v39, %v609_v39 }
  0xed   : > { %v611_v40 = vpop.f32.mrf.mxu0 }
  0xee   : > { %v692_v59 = vmul.f32 %v611_v40, %v611_v40 }
  0xf5   : > { %v614_v41 = vpop.f32.mrf.mxu0 }
  0xf6   : > { %v693_v53 = vmul.f32 %v614_v41, %v614_v41 }
  0xf8   : > { %v697_v60 = vadd.f32 %v693_v53, %v689_v54 }
  0xfd   : > { %v616_v42 = vpop.f32.mrf.mxu0 }
  0xfe   : > { %v694_v6 = vmul.f32 %v616_v42, %v616_v42 }
 0x100   : > { %v698_v12 = vadd.f32 %v694_v6, %v690_v8  ;;  %v1455_v6 = vld [vmem:[%s1949_s6] ss:$0 sm:$0xff] }
 0x105   : > { %v619_v48 = vpop.f32.mrf.mxu0 }
 0x106   : > { %v695_v56 = vmul.f32 %v619_v48, %v619_v48 }
 0x108   : > { %v699_v2 = vadd.f32 %v695_v56, %v691_v62 }
 0x10a   : > { %v707_v10 = vadd.f32 %v703_v3, %v699_v2 }
 0x10c   : > { %vm740_vm6 = vcmp.eq.f32.partialorder %v707_v10, inf  ;;  %v743_v53 = vand.u32 2147483648, %v707_v10  ;;  %vm742_vm8 = vcmp.eq.f32.partialorder %v707_v10, 0.0 }
 0x10d   : > { %v621_v52 = vpop.f32.mrf.mxu0 }
 0x10e   : > { %v696_v55 = vmul.f32 %v621_v52, %v621_v52 }
 0x110   : > { %v700_v63 = vadd.f32 %v696_v55, %v692_v59 }
 0x112   : > { %v708_v9 = vadd.f32 %v704_v0, %v700_v63  ;;  %v684_v0 = vpop.f32.mrf.mxu3 }
 0x114   : > { %vm752_vm5 = vcmp.eq.f32.partialorder %v708_v9, inf  ;;  %v755_v51 = vand.u32 2147483648, %v708_v9  ;;  %vm754_vm7 = vcmp.eq.f32.partialorder %v708_v9, 0.0 }
 0x115   : > { %v624_v58 = vpop.f32.mrf.mxu0 }
 0x116   : > { %v701_v61 = vmul.f32 %v624_v58, %v624_v58  ;;  %v661_v58 = vpop.f32.mrf.mxu1 }
 0x118   : > { %v705_v1 = vadd.f32 %v701_v61, %v697_v60 }
 0x11a   : > { %1457 = vrsqrt.f32 %v705_v1  ;;  %vm716_vm1 = vcmp.eq.f32.partialorder %v705_v1, inf  ;;  %v719_v38 = vand.u32 2147483648, %v705_v1  ;;  %vm718_vm3 = vcmp.eq.f32.partialorder %v705_v1, 0.0  ;;  %v686_v2 = vpop.f32.mrf.mxu3 }
 0x11b   : > { %1459 = vrsqrt.f32 %v708_v9 }
 0x11c   : > { %1461 = vrsqrt.f32 %v707_v10 }
 0x11d   : > { %v626_v11 = vpop.f32.mrf.mxu0 }
 0x11e   : > { %v702_v13 = vmul.f32 %v626_v11, %v626_v11  ;;  %v664_v59 = vpop.f32.mrf.mxu1  ;;  %v1340_v11 = vld [vmem:[%s1950_s7 + $0x8] sm:$0xff] }
 0x11f   : > { %969 = vmatpush.bf16.msrb.mxu2 %v1340_v11 }
 0x120   : > { %v1458_v14 = vpop.eup %1457  ;;  %v706_v15 = vadd.f32 %v702_v13, %v698_v12 }
 0x121   : > { %v710_v16 = vmul.f32 %v1458_v14, %v705_v1  ;;  %v1460_v19 = vpop.eup %1459 }
 0x122   : > { %1463 = vrsqrt.f32 %v706_v15  ;;  %v1462_v20 = vpop.eup %1461  ;;  %v746_v24 = vmul.f32 %v1460_v19, %v708_v9  ;;  %vm728_vm2 = vcmp.eq.f32.partialorder %v706_v15, inf  ;;  %v731_v39 = vand.u32 2147483648, %v706_v15  ;;  %v837_v5 = vpop.f32.mrf.mxu3 }
 0x123   : > { %v711_v17 = vmul.f32 %v1458_v14, %v710_v16  ;;  %v734_v27 = vmul.f32 %v1462_v20, %v707_v10  ;;  %vm730_vm4 = vcmp.eq.f32.partialorder %v706_v15, 0.0 }
 0x124   : > { %v747_v29 = vmul.f32 %v1460_v19, %v746_v24 }
 0x125   : > { %v712_v18 = vmul.f32 0.5, %v711_v17  ;;  %v735_v32 = vmul.f32 %v1462_v20, %v734_v27 }
 0x126   : > { %v748_v34 = vmul.f32 0.5, %v747_v29  ;;  %v666_v60 = vpop.f32.mrf.mxu1 }
 0x127   : > { %v713_v21 = vsub.f32 1.5, %v712_v18  ;;  %v736_v37 = vmul.f32 0.5, %v735_v32 }
 0x128   : > { %v1464_v22 = vpop.eup %1463  ;;  %v749_v41 = vsub.f32 1.5, %v748_v34 }
 0x129   : > { %v722_v23 = vmul.f32 %v1464_v22, %v706_v15  ;;  %v714_v25 = vmul.f32 %v1458_v14, %v713_v21  ;;  %v737_v45 = vsub.f32 1.5, %v736_v37 }
 0x12a   : > { %v750_v46 = vmul.f32 %v1460_v19, %v749_v41 }
 0x12b   : > { %v723_v26 = vmul.f32 %v1464_v22, %v722_v23  ;;  %v715_v30 = vmul.f32 %v714_v25, %v705_v1  ;;  %v738_v47 = vmul.f32 %v1462_v20, %v737_v45 }
 0x12c   : > { %v751_v48 = vmul.f32 %v750_v46, %v708_v9 }
 0x12d   : > { %v724_v28 = vmul.f32 0.5, %v723_v26  ;;  %v717_v35 = vsel %vm716_vm1, %v705_v1, %v715_v30  ;;  %v739_v49 = vmul.f32 %v738_v47, %v707_v10 }
 0x12e   : > { %v720_v42 = vsel %vm718_vm3, %v719_v38, %v717_v35  ;;  %v753_v50 = vsel %vm752_vm5, %v708_v9, %v751_v48  ;;  %v669_v61 = vpop.f32.mrf.mxu1 }
 0x12f   : > { %v725_v31 = vsub.f32 1.5, %v724_v28  ;;  %v741_v52 = vsel %vm740_vm6, %v707_v10, %v739_v49  ;;  %v756_v54 = vsel %vm754_vm7, %v755_v51, %v753_v50  ;;  %1006 = vrot.lane.b32.xlu0 %v669_v61, %s1609_s23  ;;  %v839_v10 = vpop.f32.mrf.mxu3 }
 0x130   : > { %v744_v55 = vsel %vm742_vm8, %v743_v53, %v741_v52 }
 0x131   : > { %v726_v33 = vmul.f32 %v1464_v22, %v725_v31  ;;  %v768_v56 = vpack.c.bf16 %v756_v54, %v744_v55 }
 0x133   : > { %v727_v36 = vmul.f32 %v726_v33, %v706_v15 }
 0x135   : > { %v729_v40 = vsel %vm728_vm2, %v706_v15, %v727_v36  ;;  %v1339_v15 = vld [vmem:[%s1950_s7] sm:$0xff] }
 0x136   : > { %v732_v43 = vsel %vm730_vm4, %v731_v39, %v729_v40  ;;  %v671_v62 = vpop.f32.mrf.mxu1  ;;  %970 = vmatpush.bf16.msrb.mxu2 %v1339_v15 }
 0x137   : > { %v767_v44 = vpack.c.bf16 %v732_v43, %v720_v42  ;;  %1008 = vrot.lane.b32.xlu0 %v671_v62, %s1609_s23  ;;  %v842_v20 = vpop.f32.mrf.mxu3 }
 0x139   : > { %1297 = vmatmul.msk.bf16.vlgmr.msra.gmra.mxu2 %vm576_vm0, %v767_v44 }
 0x13e   : > { %v674_v63 = vpop.f32.mrf.mxu1 }
 0x13f   : > { %1010 = vrot.lane.b32.xlu1 %v674_v63, %s1609_s23  ;;  %1030 = vrot.lane.b32.xlu0 %v684_v0, %s1609_s23  ;;  %v844_v29 = vpop.f32.mrf.mxu3 }
 0x146   : > { %v676_v1 = vpop.f32.mrf.mxu1 }
 0x147   : > { %1012 = vrot.lane.b32.xlu1 %v676_v1, %s1609_s23  ;;  %988 = vrot.lane.b32.xlu0 %v661_v58, %s1609_s23 }
 0x149   : > { %1298 = vmatmul.msk.bf16.gmra.mxu2 %vm576_vm0, %v768_v56 }
 0x14e   : > { %v679_v3 = vpop.f32.mrf.mxu1 }
 0x14f   : > { %1032 = vrot.lane.b32.xlu1 %v686_v2, %s1609_s23  ;;  %1026 = vrot.lane.b32.xlu2 %v679_v3, %s1609_s23 }
 0x156   : > { %v681_v4 = vpop.f32.mrf.mxu1 }
 0x157   : > { %990 = vrot.lane.b32.xlu1 %v664_v59, %s1609_s23  ;;  %1028 = vrot.lane.b32.xlu2 %v681_v4, %s1609_s23 }
 0x15f   : > { %986 = vrot.lane.b32.xlu2 %v659_v57, %s1609_s23 }
 0x167   : > { %992 = vrot.lane.b32.xlu2 %v666_v60, %s1609_s23 }
 0x1bc   : > { %v800_v7 = vpop.f32.mrf.mxu2 }
 0x1bd   : > { %v838_v8 = vadd.f32 %v837_v5, %v800_v7 }
 0x1bf   : > { %v1865_v9 = vadd.f32 %v1455_v6, %v838_v8 }
 0x1c1   : > { %v1309_v12 = vmul.f32 -1.442695, %v1865_v9 }
 0x1c3   : > { %1465 = vpow2.f32 %v1309_v12 }
 0x1c4   : > { %v802_v13 = vpop.f32.mrf.mxu2 }
 0x1c5   : > { %v840_v14 = vadd.f32 %v839_v10, %v802_v13 }
 0x1c7   : > { %v852_v16 = vadd.f32 %v1455_v6, %v840_v14 }
 0x1c9   : > { %v1466_v17 = vpop.eup %1465  ;;  %v1310_v18 = vmul.f32 -1.442695, %v852_v16 }
 0x1ca   : > { %v867_v19 = vadd.f32 1.0, %v1466_v17 }
 0x1cb   : > { %1467 = vpow2.f32 %v1310_v18  ;;  %v1456_v18 = vld [vmem:[%s1951_s8] ss:$0 sm:$0xff] }
 0x1cc   : > { %1469 = vrcp.f32 %v867_v19  ;;  %v805_v21 = vpop.f32.mrf.mxu2  ;;  %v882_v41 = vand.u32 2147483648, %v867_v19  ;;  %vm876_vm10 = vweird.f32 %v867_v19  ;;  %v880_v42 = vand.u32 2147483647, %v867_v19 }
 0x1cd   : > { %v843_v22 = vadd.f32 %v842_v20, %v805_v21 }
 0x1ce   : > { %v883_v48 = vor.u32 1.1754944e-38, %v882_v41  ;;  %vm881_vm13 = vcmp.eq.f32.partialorder %v880_v42, 8.507059e+37 }
 0x1cf   : > { %v1875_v23 = vadd.f32 %v1455_v6, %v843_v22  ;;  %v1027_v22 = vpop.permute.xlu2 %1026 }
 0x1d1   : > { %v1468_v24 = vpop.eup %1467  ;;  %v1311_v25 = vmul.f32 -1.442695, %v1875_v23 }
 0x1d2   : > { %v1470_v26 = vpop.eup %1469  ;;  %v868_v27 = vadd.f32 1.0, %v1468_v24 }
 0x1d3   : > { %v872_v28 = vmul.f32 %v1470_v26, %v867_v19  ;;  %1471 = vpow2.f32 %v1311_v25  ;;  %vm877_vm9 = vweird.f32 %v1470_v26  ;;  %v1007_v19 = vpop.permute.xlu0 %1006 }
 0x1d4   : > { %1473 = vrcp.f32 %v868_v27  ;;  %v807_v30 = vpop.f32.mrf.mxu2  ;;  %vm878_vm11 = vmor %vm876_vm10, %vm877_vm9  ;;  %v897_v44 = vand.u32 2147483648, %v868_v27  ;;  %v895_v47 = vand.u32 2147483647, %v868_v27  ;;  %vm891_vm14 = vweird.f32 %v868_v27 }
 0x1d5   : > { %v873_v31 = vsub.f32 1.0, %v872_v28  ;;  %v845_v32 = vadd.f32 %v844_v29, %v807_v30  ;;  %vm1074_vm10 = vcmask 130048  }
 0x1d6   : > { %v898_v53 = vor.u32 1.1754944e-38, %v897_v44  ;;  %vm896_vm1 = vcmp.eq.f32.partialorder %v895_v47, 8.507059e+37 }
 0x1d7   : > { %v874_v33 = vmul.f32 %v1470_v26, %v873_v31  ;;  %v1878_v34 = vadd.f32 %v1455_v6, %v845_v32 }
 0x1d9   : > { %v1472_v35 = vpop.eup %1471  ;;  %v1312_v36 = vmul.f32 -1.442695, %v1878_v34  ;;  %v875_v39 = vadd.f32 %v1470_v26, %v874_v33 }
 0x1da   : > { %v1474_v37 = vpop.eup %1473  ;;  %v869_v38 = vadd.f32 1.0, %v1472_v35 }
 0x1db   : > { %v887_v40 = vmul.f32 %v1474_v37, %v868_v27  ;;  %1475 = vpow2.f32 %v1312_v36  ;;  %v879_v45 = vsel %vm878_vm11, %v1470_v26, %v875_v39  ;;  %vm892_vm12 = vweird.f32 %v1474_v37  ;;  %v1009_v28 = vpop.permute.xlu0 %1008 }
 0x1dc   : > { %1477 = vrcp.f32 %v869_v38  ;;  %v884_v52 = vsel %vm881_vm13, %v883_v48, %v879_v45  ;;  %vm893_vm15 = vmor %vm891_vm14, %vm892_vm12  ;;  %v912_v2 = vand.u32 2147483648, %v869_v38  ;;  %vm906_vm3 = vweird.f32 %v869_v38 }
 0x1dd   : > { %v888_v43 = vsub.f32 1.0, %v887_v40  ;;  %v931_v58 = vmul.f32 %v884_v52, %v1865_v9  ;;  %v910_v3 = vand.u32 2147483647, %v869_v38  ;;  %vm1083_vm11 = vcmask 392192  }
 0x1de   : > { %v913_v9 = vor.u32 1.1754944e-38, %v912_v2  ;;  %vm1088_vm12 = vcmask 523264  }
 0x1df   : > { %v889_v46 = vmul.f32 %v1474_v37, %v888_v43  ;;  %vm911_vm6 = vcmp.eq.f32.partialorder %v910_v3, 8.507059e+37 }
 0x1e1   : > { %v1476_v49 = vpop.eup %1475  ;;  %v890_v50 = vadd.f32 %v1474_v37, %v889_v46 }
 0x1e2   : > { %v1478_v51 = vpop.eup %1477  ;;  %v870_v54 = vadd.f32 1.0, %v1476_v49 }
 0x1e3   : > { %v894_v55 = vsel %vm893_vm15, %v1474_v37, %v890_v50  ;;  %v902_v56 = vmul.f32 %v1478_v51, %v869_v38  ;;  %vm907_vm2 = vweird.f32 %v1478_v51  ;;  %v1029_v37 = vpop.permute.xlu2 %1028  ;;  %v1031_v41 = vpop.permute.xlu0 %1030 }
 0x1e4   : > { %v899_v57 = vsel %vm896_vm1, %v898_v53, %v894_v55  ;;  %1479 = vrcp.f32 %v870_v54  ;;  %vm908_vm4 = vmor %vm906_vm3, %vm907_vm2  ;;  %v927_v5 = vand.u32 2147483648, %v870_v54  ;;  %v925_v8 = vand.u32 2147483647, %v870_v54 }
 0x1e5   : > { %v932_v59 = vmul.f32 %v899_v57, %v852_v16  ;;  %v903_v60 = vsub.f32 1.0, %v902_v56  ;;  %vm921_vm7 = vweird.f32 %v870_v54 }
 0x1e6   : > { %v928_v12 = vor.u32 1.1754944e-38, %v927_v5  ;;  %vm926_vm9 = vcmp.eq.f32.partialorder %v925_v8, 8.507059e+37 }
 0x1e7   : > { %v935_v61 = vpack.c.bf16 %v932_v59, %v931_v58  ;;  %v904_v62 = vmul.f32 %v1478_v51, %v903_v60 }
 0x1e9   : > { %1321 = vmatmul.msk.bf16.vlgmr.msrb.gmra.mxu2 %vm576_vm0, %v935_v61  ;;  %v905_v0 = vadd.f32 %v1478_v51, %v904_v62 }
 0x1ea   : > { %v1480_v63 = vpop.eup %1479 }
 0x1eb   : > { %v917_v1 = vmul.f32 %v1480_v63, %v870_v54  ;;  %v909_v6 = vsel %vm908_vm4, %v1478_v51, %v905_v0  ;;  %vm922_vm5 = vweird.f32 %v1480_v63  ;;  %v987_v43 = vpop.permute.xlu2 %986  ;;  %v989_v45 = vpop.permute.xlu0 %988 }
 0x1ec   : > { %v914_v11 = vsel %vm911_vm6, %v913_v9, %v909_v6  ;;  %vm923_vm8 = vmor %vm921_vm7, %vm922_vm5 }
 0x1ed   : > { %v918_v4 = vsub.f32 1.0, %v917_v1  ;;  %v933_v15 = vmul.f32 %v914_v11, %v1875_v23  ;;  %v1011_v23 = vpop.permute.xlu1 %1010 }
 0x1ef   : > { %v919_v7 = vmul.f32 %v1480_v63, %v918_v4 }
 0x1f1   : > { %v920_v10 = vadd.f32 %v1480_v63, %v919_v7 }
 0x1f3   : > { %v924_v13 = vsel %vm923_vm8, %v1480_v63, %v920_v10  ;;  %v993_v44 = vpop.permute.xlu2 %992 }
 0x1f4   : > { %v929_v14 = vsel %vm926_vm9, %v928_v12, %v924_v13 }
 0x1f5   : > { %v934_v16 = vmul.f32 %v929_v14, %v1878_v34  ;;  %v1013_v30 = vpop.permute.xlu1 %1012 }
 0x1f7   : > { %v936_v17 = vpack.c.bf16 %v934_v16, %v933_v15 }
 0x1f9   : > { %1322 = vmatmul.msk.bf16.gmra.mxu2 %vm576_vm0, %v936_v17 }
 0x1fd   : > { %v1033_v36 = vpop.permute.xlu1 %1032 }
 0x205   : > { %v991_v46 = vpop.permute.xlu1 %990 }
 0x26c   : > { %v972_v20 = vpop.f32.mrf.mxu2 }
 0x26d   : > { %v973_v21 = vadd.f32 %v1456_v18, %v972_v20 }
 0x26f   : > { %v1038_v24 = vmul.f32 %v1027_v22, %v973_v21  ;;  %v1018_v25 = vmul.f32 %v1007_v19, %v973_v21  ;;  %v998_v47 = vmul.f32 %v987_v43, %v973_v21 }
 0x271   : > { %1062 = vrot.lane.b32.xlu1 %v1038_v24, %s1610_s18  ;;  %1046 = vrot.lane.b32.xlu0 %v1018_v25, %s1609_s23  ;;  %v1075_v51 = vsel %vm1074_vm10, %v973_v21, %v998_v47 }
 0x274   : > { %v974_v26 = vpop.f32.mrf.mxu2 }
 0x275   : > { %v975_v27 = vadd.f32 %v1456_v18, %v974_v26 }
 0x277   : > { %v1019_v29 = vmul.f32 %v1009_v28, %v975_v27  ;;  %v1039_v40 = vmul.f32 %v1029_v37, %v975_v27  ;;  %v999_v55 = vmul.f32 %v989_v45, %v975_v27 }
 0x279   : > { %1048 = vrot.lane.b32.xlu1 %v1019_v29, %s1609_s23  ;;  %v1076_v56 = vsel %vm1074_vm10, %v975_v27, %v999_v55 }
 0x27c   : > { %v977_v31 = vpop.f32.mrf.mxu2 }
 0x27d   : > { %v978_v32 = vadd.f32 %v1456_v18, %v977_v31 }
 0x27f   : > { %v1020_v33 = vmul.f32 %v1011_v23, %v978_v32  ;;  %v1040_v42 = vmul.f32 %v1031_v41, %v978_v32  ;;  %v1000_v4 = vmul.f32 %v991_v46, %v978_v32 }
 0x281   : > { %1050 = vrot.lane.b32.xlu2 %v1020_v33, %s1609_s23  ;;  %v1077_v6 = vsel %vm1074_vm10, %v978_v32, %v1000_v4 }
 0x284   : > { %v979_v34 = vpop.f32.mrf.mxu2 }
 0x285   : > { %v980_v35 = vadd.f32 %v1456_v18, %v979_v34 }
 0x287   : > { %v1041_v38 = vmul.f32 %v1033_v36, %v980_v35  ;;  %v1021_v39 = vmul.f32 %v1013_v30, %v980_v35  ;;  %v1001_v62 = vmul.f32 %v993_v44, %v980_v35 }
 0x289   : > { %1068 = vrot.lane.b32.xlu1 %v1041_v38, %s1610_s18  ;;  %1052 = vrot.lane.b32.xlu0 %v1021_v39, %s1609_s23  ;;  %v1078_v1 = vsel %vm1074_vm10, %v980_v35, %v1001_v62 }
 0x28a   : > { %1064 = vrot.lane.b32.xlu2 %v1039_v40, %s1610_s18 }
 0x291   : > { %1066 = vrot.lane.b32.xlu0 %v1040_v42, %s1610_s18 }
 0x2db   : > { %v1051_v48 = vpop.permute.xlu2 %1050 }
 0x2dc   : > { %v1081_v7 = vsel %vm576_vm0, %v1077_v6, %v1051_v48 }
 0x2e3   : > { %v1063_v49 = vpop.permute.xlu1 %1062  ;;  %v1047_v50 = vpop.permute.xlu0 %1046 }
 0x2e4   : > { %v1079_v52 = vsel %vm576_vm0, %v1075_v51, %v1047_v50  ;;  %v1065_v58 = vpop.permute.xlu2 %1064 }
 0x2e5   : > { %v1084_v53 = vsel %vm1083_vm11, %v1079_v52, %v1063_v49 }
 0x2e6   : > { %v1089_v54 = vsel %vm1088_vm12, %v1084_v53, 0.0 }
 0x2e7   : > { %1093 = vst [vmem:[%s520_s29] sm:$0xff] %v1089_v54 }
 0x2eb   : > { %v1049_v57 = vpop.permute.xlu1 %1048 }
 0x2ec   : > { %v1080_v59 = vsel %vm576_vm0, %v1076_v56, %v1049_v57 }
 0x2ed   : > { %v1085_v60 = vsel %vm1083_vm11, %v1080_v59, %v1065_v58 }
 0x2ee   : > { %v1090_v61 = vsel %vm1088_vm12, %v1085_v60, 0.0 }
 0x2ef   : > { %1094 = vst [vmem:[%s520_s29 + $0x8] sm:$0xff] %v1090_v61 }
 0x2fb   : > { %v1069_v63 = vpop.permute.xlu1 %1068  ;;  %v1053_v0 = vpop.permute.xlu0 %1052 }
 0x2fc   : > { %v1082_v2 = vsel %vm576_vm0, %v1078_v1, %v1053_v0 }
 0x2fd   : > { %v1087_v3 = vsel %vm1083_vm11, %v1082_v2, %v1069_v63 }
 0x2fe   : > { %v1092_v5 = vsel %vm1088_vm12, %v1087_v3, 0.0 }
 0x2ff   : > { %1096 = vst [vmem:[%s520_s29 + $0x18] sm:$0xff] %v1092_v5 }
 0x303   : > { %v1067_v8 = vpop.permute.xlu0 %1066 }
 0x304   : > { %v1086_v9 = vsel %vm1083_vm11, %v1081_v7, %v1067_v8 }
 0x305   : > { %v1091_v10 = vsel %vm1088_vm12, %v1086_v9, 0.0 }
 0x306   : > { %1095 = vst [vmem:[%s520_s29 + $0x10] sm:$0xff] %v1091_v10 }
 0x307   : > { %1508 = shalt.err (!%p1505_p3)
}
 0x308   : > { %s1611_s16 = smov 128   ;;  %s1612_s29 = smov 8  }
 0x309   : > { %1348 = dma.vmem_to_hbm [thread:$0]  (%p1702_p6), %s1111_s21, 512, %s1113_s13, %s1098_s1, %s1611_s16, %s1611_s16, %s1612_s29  }
 0x30a PF: > { %s1127_s26 = sand.u32 1, %s1563_s30   ;;  %p1351_p4 = pnand %p1243_p9, %p1706_p8 }
 0x30b   : > { %s1128_s25 = scalar_lea.sflag [#allocation4], %s1127_s26 }
 0x30c   : > { %p1352_p5 = pneg %p1351_p4 }
 0x30e   : > { %1558 = dma.done.wait (%p1352_p5), %s1128_s25, 512  }
 0x30f   : > { %1560 = vsyncadd (%p1352_p5), %s1128_s25, 4294966784  ;;  %s1966_s23 = sld [smem:[#allocation6_spill]]  ;;  %p19_p7 = scmp.ge.s32.totalorder %s1688_s15, 4  }
 0x310   : > { %s1967_s11 = sld [smem:[#allocation7_spill]]  ;;  %s1968_s30 = smov %s1567_s10 }
 0x311   : > { %s1970_s12 = smov %s1688_s15  ;;  %21 = sbr.rel (!%p19_p7) target bundleno = 5 (0x5), region = 181 }
 0x315   : > { %s1969_s10 = smov %s1966_s23 }
 0x316   :  { %1134 = vsyncpa [#allocation4], 1 }
 0x317   :  { %1136 = vsyncpa [#allocation4 + $0x1], 1 }

// kernel: tpu_custom_call.1
= control target key start
LH: loop header
LB: loop body
LE: loop exit
PB: predicated region body
PF: predicated region fallthrough
CT: control target
= control target key end

     0   :  { %s1943_s0 = inlined_call_operand.vmem [shape: f32[40,32], index: 0, kind: input, shape index: {}]   ;;  %s1944_s1 = inlined_call_operand.vmem [shape: f32[3,40,32], index: 1, kind: input, shape index: {}]   ;;  %s1945_s2 = inlined_call_operand.vmem [shape: bf16[32,32], index: 2, kind: input, shape index: {}]   ;;  %s1946_s3 = inlined_call_operand.vmem [shape: bf16[32,16], index: 3, kind: input, shape index: {}]   ;;  %s1947_s4 = inlined_call_operand.vmem [shape: bf16[32,32], index: 4, kind: input, shape index: {}]   ;;  %s1948_s5 = inlined_call_operand.vmem [shape: bf16[32,32], index: 5, kind: input, shape index: {}]   ;;  %s1949_s6 = inlined_call_operand.vmem [shape: f32[1,32], index: 6, kind: input, shape index: {}]   ;;  %s1950_s7 = inlined_call_operand.vmem [shape: bf16[32,32], index: 7, kind: input, shape index: {}]   ;;  %s1951_s8 = inlined_call_operand.vmem [shape: f32[1,32], index: 8, kind: input, shape index: {}]   ;;  %s1952_s9 = inlined_call_operand.hbm [shape: f32[64,128], index: 9, kind: output, shape index: {}]  }
   0x1   :  { %1954 = sst [smem:[#allocation8_spill]] %s1944_s1 }
   0x2   :  { %14 = vsyncpa [#allocation4], 0 }
   0x3   :  { %16 = vsyncpa [#allocation4 + $0x1], 0  ;;  %s1663_s30 = smov 0   ;;  %s1665_s10 = smov 0  }
   0x4   :  { %s1667_s11 = smov 0   ;;  %s1669_s12 = smov 0  }
   0x5 LB: > { %1955 = sst [smem:[#allocation6_spill]] %s1571_s11  ;;  %s1684_s13 = sadd.s32 4294967295, %s1575_s12   ;;  %s1575_s12 = sphi %s1669_s12, %s1970_s12   ;;  %s1571_s11 = sphi %s1667_s11, %s1967_s11   ;;  %s1567_s10 = sphi %s1665_s10, %s1969_s10   ;;  %s1563_s30 = sphi %s1663_s30, %s1968_s30  }
   0x6   : > { %s1241_s14 = sadd.s32 4294967294, %s1575_s12   ;;  %s1688_s15 = sadd.s32 1, %s1575_s12  }
   0x7   : > { %s55_s16 = sadd.s32 1, %s1571_s11  ;;  %s52_s17 = ssub.s32 %s1575_s12, %s1688_s15 }
   0x8   : > { %p62_p0 = scmp.ne.s32.totalorder %s1571_s11, %s1567_s10  ;;  %p53_p1 = scmp.eq.s32.totalorder %s52_s17, 0 }
   0x9   : > { %p63_p2 = scmp.eq.s32.totalorder %s1575_s12, 0  ;;  %p239_p3 = scmp.eq.s32.totalorder %s1684_s13, 1 }
   0xa   : > { %p244_p4 = scmp.ne.s32.totalorder %s1567_s10, %s1563_s30  ;;  %p245_p7 = scmp.eq.s32.totalorder %s1241_s14, 1 }
   0xb   : > { %s1700_s18 = scalar_select %p53_p1, %s1571_s11, %s55_s16  }
   0xc   : > { %p64_p5 = por %p63_p2, %p62_p0  ;;  %p1702_p6 = por %p239_p3, %p62_p0 }
   0xd   : > { %1956 = sst [smem:[#allocation7_spill]] %s1700_s18  ;;  %p1706_p8 = por %p245_p7, %p244_p4 }
   0xe   : > { %p1243_p9 = scmp.ge.s32.totalorder %s1575_s12, 2 }
  0x10   : > { %282 = sbr.rel (%p1243_p9) target bundleno = 71 (0x47), region = 44 }
  0x15   : > { %302 = sbr.rel (!%p64_p5) target bundleno = 71 (0x47), region = 52  ;;  %s304_s21 = sand.u32 (%p64_p5), 1, %s1571_s11  }
  0x16   : > { %s1244_s22 = sshll.u32 (%p64_p5), %s1575_s12, 2  ;;  %s1346_s23 = smul.u32 (%p64_p5), 96, %s304_s21 }
  0x17   : > { %s308_s24 = ssub.s32 (%p64_p5), 5, %s1244_s22  ;;  %s1328_s25 = sshll.u32 (%p64_p5), %s1575_s12, 5 }
  0x18   : > { %p309_p10 = scmp.lt.s32.totalorder (%p64_p5), %s308_s24, 4  ;;  %s1959_s1 = sld [smem:[#allocation8_spill]] (%p64_p5) }
  0x19   : > { %s1724_s14 = scalar_lea.vmem (%p64_p5), [#allocation2], %s1346_s23  }
  0x1a   : > { %s1972_s24 = smov (!%p309_p10, %s308_s24), 4 }
  0x1b   : > { %s311_s29 = smul.u32 24, %s1972_s24 }
  0x1d   : > { %p1247_p11 = scmp.eq.s32.totalorder %s311_s29, 0 }
  0x1e   : > { %s1719_s28 = scalar_lea.vmem %s1959_s1, %s1328_s25   ;;  %s1727_s16 = sshrl.u32 (!%p1247_p11), %s1972_s24, 2 }
  0x1f   : > { %317 = sbr.rel (%p1247_p11) target bundleno = 71 (0x47), region = 56  ;;  %p1248_p12 = scmp.le.s32.totalorder (!%p1247_p11), %s1727_s16, 0 }
  0x24   : > { %1191 = sbr.rel (%p1248_p12) target bundleno = 54 (0x36), region = 153  ;;  %s1960_s17 = smov (!%p1248_p12), %s1724_s14 }
  0x25   : > { %s1961_s21 = smov (!%p1248_p12), %s1719_s28  ;;  %s1736_s22 = smov (!%p1248_p12), 0  }
  0x26   : > { %s1738_s25 = smov (!%p1248_p12), 0  }
  0x29 LB: >> { %v406_v0 = vld [vmem:[%s1583_s21] sm:$0xff]  ;;  %v408_v1 = vld [vmem:[%s1583_s21 + $0x8] sm:$0xff]  ;;  %v410_v2 = vld [vmem:[%s1583_s21 + $0x10] sm:$0xff]  ;;  %s430_s23 = sadd.s32 1, %s1587_s22  ;;  %s400_s25 = sadd.s32 1, %s1591_s25   ;;  %s1591_s25 = sphi %s1738_s25, %s400_s25   ;;  %s1587_s22 = sphi %s1736_s22, %s1964_s22   ;;  %s1583_s21 = sphi %s1961_s21, %s1963_s21   ;;  %s1579_s17 = sphi %s1960_s17, %s1962_s17  }
  0x2a   : >> { %407 = vst [vmem:[%s1579_s17] sm:$0xff] %v406_v0  ;;  %v412_v3 = vld [vmem:[%s1583_s21 + $0x18] sm:$0xff]  ;;  %p431_p13 = scmp.ge.s32.totalorder %s430_s23, %s1727_s16  ;;  %v414_v4 = vld [vmem:[%s1583_s21 + $0x28] sm:$0xff]  ;;  %v416_v5 = vld [vmem:[%s1583_s21 + $0x30] sm:$0xff]  ;;  %p399_p0 = scmp.ge.s32.totalorder %s400_s25, %s1727_s16 }
  0x2b   : >> { %409 = vst [vmem:[%s1579_s17 + $0x8] sm:$0xff] %v408_v1  ;;  %v418_v6 = vld [vmem:[%s1583_s21 + $0x38] sm:$0xff]  ;;  %v420_v7 = vld [vmem:[%s1583_s21 + $0x40] sm:$0xff]  ;;  %v422_v8 = vld [vmem:[%s1583_s21 + $0x50] sm:$0xff] }
  0x2c   : >> { %411 = vst [vmem:[%s1579_s17 + $0x10] sm:$0xff] %v410_v2  ;;  %s1974_s23 = smov (%p431_p13, %s430_s23), 0  ;;  %v424_v9 = vld [vmem:[%s1583_s21 + $0x58] sm:$0xff]  ;;  %v426_v10 = vld [vmem:[%s1583_s21 + $0x60] sm:$0xff]  ;;  %v428_v11 = vld [vmem:[%s1583_s21 + $0x68] sm:$0xff] }
  0x2d   : >> { %413 = vst [vmem:[%s1579_s17 + $0x18] sm:$0xff] %v412_v3  ;;  %s1249_s26 = sshll.u32 %s1974_s23, 5  ;;  %s1964_s22 = smov %s1974_s23 }
  0x2e   : >> { %415 = vst [vmem:[%s1579_s17 + $0x20] sm:$0xff] %v414_v4  ;;  %s435_s27 = scalar_lea.vmem %s1719_s28, %s1249_s26   ;;  %s436_s29 = scalar_lea.vmem %s1724_s14, %s1249_s26 [#allocation2]  }
  0x2f   : >> { %417 = vst [vmem:[%s1579_s17 + $0x28] sm:$0xff] %v416_v5  ;;  %s1963_s21 = smov %s435_s27 }
  0x30   : >> { %419 = vst [vmem:[%s1579_s17 + $0x30] sm:$0xff] %v418_v6 }
  0x31   : >> { %421 = vst [vmem:[%s1579_s17 + $0x38] sm:$0xff] %v420_v7  ;;  %402 = sbr.rel (!%p399_p0) target bundleno = 41 (0x29), region = 159 }
  0x32   : >> { %423 = vst [vmem:[%s1579_s17 + $0x40] sm:$0xff] %v422_v8 }
  0x33   : >> { %425 = vst [vmem:[%s1579_s17 + $0x48] sm:$0xff] %v424_v9 }
  0x34   : >> { %427 = vst [vmem:[%s1579_s17 + $0x50] sm:$0xff] %v426_v10 }
  0x35   : >> { %429 = vst [vmem:[%s1579_s17 + $0x58] sm:$0xff] %v428_v11  ;;  %s1962_s17 = smov %s436_s29 }
  0x36 PF: > { %s1774_s26 = sand.u32 3, %s1972_s24   ;;  %s1329_s1 = sshll.u32 %s1727_s16, 5 }
  0x37   : > { %s1778_s18 = scalar_lea.vmem %s1719_s28, %s1329_s1   ;;  %s1781_s11 = scalar_lea.vmem %s1724_s14, %s1329_s1 [#allocation2]  }
  0x38   : > { %p1254_p1 = scmp.le.s32.totalorder %s1774_s26, 0 }
  0x39   : > { %s1965_s25 = smov (!%p1254_p1), %s1781_s11  ;;  %s1597_s23 = smov (!%p1254_p1), %s1778_s18  }
  0x3a   : > { %1205 = sbr.rel (%p1254_p1) target bundleno = 71 (0x47), region = 164  ;;  %s1601_s17 = smov (!%p1254_p1), 0  }
  0x3b   : > { %s1605_s21 = smov (!%p1254_p1), 0  }
  0x3f LB: >> { %v453_v12 = vld [vmem:[%s1599_s23] sm:$0xff]  ;;  %v455_v13 = vld [vmem:[%s1599_s23 + $0x28] sm:$0xff]  ;;  %v457_v14 = vld [vmem:[%s1599_s23 + $0x50] sm:$0xff]  ;;  %s459_s1 = sadd.s32 1, %s1603_s17  ;;  %s447_s21 = sadd.s32 1, %s1607_s21   ;;  %s1607_s21 = sphi %s1605_s21, %s447_s21   ;;  %s1603_s17 = sphi %s1601_s17, %s1602_s17   ;;  %s1599_s23 = sphi %s1597_s23, %s464_s23   ;;  %s1595_s25 = sphi %s1965_s25, %s465_s25  }
  0x40   : >> { %454 = vst [vmem:[%s1595_s25] sm:$0xff] %v453_v12  ;;  %p460_p2 = scmp.ge.s32.totalorder %s459_s1, %s1774_s26  ;;  %p446_p3 = scmp.ge.s32.totalorder %s447_s21, %s1774_s26 }
  0x41   : >> { %456 = vst [vmem:[%s1595_s25 + $0x20] sm:$0xff] %v455_v13 }
  0x42   : >> { %458 = vst [vmem:[%s1595_s25 + $0x40] sm:$0xff] %v457_v14  ;;  %s1976_s1 = smov (%p460_p2, %s459_s1), 0  ;;  %449 = sbr.rel (!%p446_p3) target bundleno = 63 (0x3f), region = 170 }
  0x43   : >> { %s1255_s24 = sshll.u32 %s1976_s1, 3  ;;  %s1602_s17 = smov %s1976_s1  }
  0x44   : >> { %s464_s23 = scalar_lea.vmem %s1778_s18, %s1255_s24   ;;  %s465_s25 = scalar_lea.vmem %s1781_s11, %s1255_s24 [#allocation2]  }
  0x47 PF: > { %p1257_p4 = scmp.ge.s32.totalorder %s1575_s12, 1  ;;  %p470_p5 = scmp.lt.s32.totalorder %s1575_s12, 3 }
  0x49   : > { %p471_p7 = pnand %p1257_p4, %p470_p5 }
  0x4a   : > { %s1801_s16 = sand.u32 (!%p471_p7), 1, %s1567_s10   ;;  %s1259_s17 = sshll.u32 (!%p471_p7), %s1684_s13, 2 }
  0x4b   : > { %474 = sbr.rel (%p471_p7) target bundleno = 778 (0x30a), region = 104  ;;  %p526_p10 = scmp.lt.s32.totalorder (!%p471_p7), %s1259_s17, 4 }
  0x4c   : > { %s1347_s22 = smul.u32 (!%p471_p7), 96, %s1801_s16  ;;  %s1609_s23 = smov (!%p471_p7), 16  }
  0x4d   : > { %s1610_s18 = smov (!%p471_p7), 32   ;;  %s1341_s26 = sshll.u32 (!%p471_p7), %s1684_s13, 5 }
  0x4e   : > { %s479_s27 = scalar_lea.vmem (!%p471_p7), [#allocation2], %s1347_s22  ;;  %s1098_s1 = scalar_lea.sflag (!%p471_p7), [#allocation4], %s1801_s16 }
  0x4f   : > { %s1501_s11 = scalar_lea.hbm (!%p471_p7), %s1952_s9, 64 }
  0x50   : > { %v1332_v15 = vld [vmem:[%s1945_s2 + $0x8] sm:$0xff]  ;;  %v1331_v16 = vld [vmem:[%s1945_s2] sm:$0xff]  ;;  %vm576_vm0 = vcmask 261120   ;;  %v552_v20 = vld [vmem:[%s479_s27 + $0x50] sm:$0xff]  ;;  %s1978_s17 = smov (!%p526_p10, %s1259_s17), 4 }
  0x51   : > { %601 = vmatpush.bf16.msra.mxu0 %v1332_v15  ;;  %1342 = vmatpush.bf16.msra.mxu3 %v1332_v15  ;;  %v542_v17 = vld [vmem:[%s479_s27] sm:$0xff]  ;;  %v543_v18 = vld [vmem:[%s479_s27 + $0x8] sm:$0xff]  ;;  %v553_v21 = vld [vmem:[%s479_s27 + $0x58] sm:$0xff]  ;;  %s1260_s21 = sshll.u32 %s1978_s17, 3  ;;  %s1109_s17 = scalar_lea.hbm %s1952_s9, %s1341_s26 }
  0x52   : > { %v554_v19 = vpack.c.bf16 %v543_v18, %v542_v17  ;;  %v559_v22 = vpack.c.bf16 %v553_v21, %v552_v20  ;;  %v544_v23 = vld [vmem:[%s479_s27 + $0x10] sm:$0xff]  ;;  %v545_v24 = vld [vmem:[%s479_s27 + $0x18] sm:$0xff]  ;;  %v546_v26 = vld [vmem:[%s479_s27 + $0x20] sm:$0xff]  ;;  %s1828_s28 = scalar_lea.vmem %s1943_s0, %s1260_s21  ;;  %s1112_s13 = sshll.u32 %s1109_s17, 4  ;;  %s1113_s13 = int_to_ptr.hbm [resolvable:$true] %s1112_s13 }
  0x53   : > { %v555_v25 = vpack.c.bf16 %v545_v24, %v544_v23  ;;  %v547_v27 = vld [vmem:[%s479_s27 + $0x28] sm:$0xff]  ;;  %v548_v29 = vld [vmem:[%s479_s27 + $0x30] sm:$0xff]  ;;  %v549_v30 = vld [vmem:[%s479_s27 + $0x38] sm:$0xff]  ;;  %s1495_s24 = sshra.s32 %s1113_s13, 4  ;;  %s1496_s24 = int_to_ptr.hbm [resolvable:$true] %s1495_s24 }
  0x54   : > { %v556_v28 = vpack.c.bf16 %v547_v27, %v546_v26  ;;  %v557_v31 = vpack.c.bf16 %v549_v30, %v548_v29  ;;  %v550_v32 = vld [vmem:[%s479_s27 + $0x40] sm:$0xff]  ;;  %v551_v33 = vld [vmem:[%s479_s27 + $0x48] sm:$0xff]  ;;  %v759_v4 = vld [vmem:[%s1828_s28 + $0x10] sm:$0xff]  ;;  %s1258_s27 = sshll.u32 %s1801_s16, 5  ;;  %p1502_p0 = scmp.lt.s32.totalorder %s1496_s24, %s1952_s9 }
  0x55   : > { %602 = vmatpush.bf16.msra.mxu0 %v1331_v16  ;;  %1343 = vmatpush.bf16.msra.mxu3 %v1331_v16  ;;  %v558_v34 = vpack.c.bf16 %v551_v33, %v550_v32  ;;  %v1334_v35 = vld [vmem:[%s1946_s3 + $0x8] sm:$0xff]  ;;  %v1333_v36 = vld [vmem:[%s1946_s3] sm:$0xff]  ;;  %v760_v5 = vld [vmem:[%s1828_s28 + $0x18] sm:$0xff]  ;;  %s520_s29 = scalar_lea.vmem [#allocation3], %s1258_s27 }
  0x56   : > { %656 = vmatpush.bf16.msra.mxu1 %v1334_v35  ;;  %v1336_v43 = vld [vmem:[%s1947_s4 + $0x8] sm:$0xff]  ;;  %v1335_v45 = vld [vmem:[%s1947_s4] sm:$0xff]  ;;  %v762_v7 = vpack.c.bf16 %v760_v5, %v759_v4  ;;  %s1110_s21 = sshll.u32 %s520_s29, 4  ;;  %s1111_s21 = int_to_ptr.vmem [resolvable:$true] %s1110_s21 }
  0x57   : > { %v1338_v44 = vld [vmem:[%s1948_s5 + $0x8] sm:$0xff]  ;;  %v757_v46 = vld [vmem:[%s1828_s28] sm:$0xff] }
  0x58   : > { %1269 = vmatmul.msk.bf16.vlgmr.msra.gmra.mxu0 %vm576_vm0, %v554_v19  ;;  %1274 = vmatmul.msk.bf16.vlgmr.msra.gmra.mxu3 %vm576_vm0, %v559_v22  ;;  %v758_v47 = vld [vmem:[%s1828_s28 + $0x8] sm:$0xff]  ;;  %v1337_v49 = vld [vmem:[%s1948_s5] sm:$0xff]  ;;  %s1497_s28 = scalar_lea.hbm %s1496_s24, 32 }
  0x59   : > { %1344 = vmatpush.bf16.msrb.mxu3 %v1334_v35  ;;  %797 = vmatpush.bf16.msra.mxu2 %v1338_v44  ;;  %v761_v50 = vpack.c.bf16 %v758_v47, %v757_v46  ;;  %p1498_p11 = scmp.ne.s32.totalorder %s1496_s24, %s1497_s28  ;;  %p1503_p1 = scmp.lt.s32.totalorder %s1501_s11, %s1497_s28 }
  0x5a   : > { %657 = vmatpush.bf16.msra.mxu1 %v1333_v36 }
  0x5b   : > { %p1499_p12 = pnand %p1498_p11, %p1702_p6  ;;  %p1504_p2 = por %p1503_p1, %p1502_p0 }
  0x5d   : > { %1345 = vmatpush.bf16.msrb.mxu3 %v1333_v36  ;;  %1283 = vmatmul.msk.bf16.vlgmr.msra.gmra.mxu1 %vm576_vm0, %v554_v19  ;;  %p1500_p13 = pneg %p1499_p12 }
  0x5e   : > { %798 = vmatpush.bf16.msra.mxu2 %v1337_v49 }
  0x5f   : > { %p1505_p3 = pnand %p1504_p2, %p1500_p13 }
  0x61   : > { %834 = vmatpush.bf16.msra.mxu3 %v1336_v43 }
  0x65   : > { %835 = vmatpush.bf16.msra.mxu3 %v1335_v45 }
  0x68   : > { %1270 = vmatmul.msk.bf16.gmra.mxu0 %vm576_vm0, %v555_v25  ;;  %1288 = vmatmul.msk.bf16.vlgmr.msrb.gmra.mxu3 %vm576_vm0, %v559_v22 }
  0x6d   : > { %1284 = vmatmul.msk.bf16.gmra.mxu1 %vm576_vm0, %v555_v25 }
  0x78   : > { %1271 = vmatmul.msk.bf16.gmra.mxu0 %vm576_vm0, %v556_v28  ;;  %1307 = vmatmul.msk.bf16.vlgmr.msra.gmra.mxu3 %vm576_vm0, %v761_v50 }
  0x7d   : > { %1285 = vmatmul.msk.bf16.gmra.mxu1 %vm576_vm0, %v556_v28 }
  0x88   : > { %1272 = vmatmul.msk.bf16.gmra.mxu0 %vm576_vm0, %v557_v31  ;;  %1308 = vmatmul.msk.bf16.gmra.mxu3 %vm576_vm0, %v762_v7 }
  0x8d   : > { %1286 = vmatmul.msk.bf16.gmra.mxu1 %vm576_vm0, %v557_v31 }
  0x98   : > { %1273 = vmatmul.msk.bf16.gmra.mxu0 %vm576_vm0, %v558_v34 }
  0x9d   : > { %1287 = vmatmul.msk.bf16.gmra.mxu1 %vm576_vm0, %v558_v34 }
  0xd5   : > { %v604_v37 = vpop.f32.mrf.mxu0 }
  0xd6   : > { %v689_v54 = vmul.f32 %v604_v37, %v604_v37 }
  0xdb   : > { %v629_v51 = vpop.f32.mrf.mxu3 }
  0xdc   : > { %v703_v3 = vmul.f32 %v629_v51, %v629_v51 }
  0xdd   : > { %v606_v38 = vpop.f32.mrf.mxu0 }
  0xde   : > { %v690_v8 = vmul.f32 %v606_v38, %v606_v38 }
  0xe3   : > { %v631_v57 = vpop.f32.mrf.mxu3 }
  0xe4   : > { %v704_v0 = vmul.f32 %v631_v57, %v631_v57  ;;  %v659_v57 = vpop.f32.mrf.mxu1 }
  0xe5   : > { %v609_v39 = vpop.f32.mrf.mxu0 }
  0xe6   : > { %v691_v62 = vmul.f32 %v609_v39, %v609_v39 }
  0xed   : > { %v611_v40 = vpop.f32.mrf.mxu0 }
  0xee   : > { %v692_v59 = vmul.f32 %v611_v40, %v611_v40 }
  0xf5   : > { %v614_v41 = vpop.f32.mrf.mxu0 }
  0xf6   : > { %v693_v53 = vmul.f32 %v614_v41, %v614_v41 }
  0xf8   : > { %v697_v60 = vadd.f32 %v693_v53, %v689_v54 }
  0xfd   : > { %v616_v42 = vpop.f32.mrf.mxu0 }
  0xfe   : > { %v694_v6 = vmul.f32 %v616_v42, %v616_v42 }
 0x100   : > { %v698_v12 = vadd.f32 %v694_v6, %v690_v8  ;;  %v1455_v6 = vld [vmem:[%s1949_s6] ss:$0 sm:$0xff] }
 0x105   : > { %v619_v48 = vpop.f32.mrf.mxu0 }
 0x106   : > { %v695_v56 = vmul.f32 %v619_v48, %v619_v48 }
 0x108   : > { %v699_v2 = vadd.f32 %v695_v56, %v691_v62 }
 0x10a   : > { %v707_v10 = vadd.f32 %v703_v3, %v699_v2 }
 0x10c   : > { %vm740_vm6 = vcmp.eq.f32.partialorder %v707_v10, inf  ;;  %v743_v53 = vand.u32 2147483648, %v707_v10  ;;  %vm742_vm8 = vcmp.eq.f32.partialorder %v707_v10, 0.0 }
 0x10d   : > { %v621_v52 = vpop.f32.mrf.mxu0 }
 0x10e   : > { %v696_v55 = vmul.f32 %v621_v52, %v621_v52 }
 0x110   : > { %v700_v63 = vadd.f32 %v696_v55, %v692_v59 }
 0x112   : > { %v708_v9 = vadd.f32 %v704_v0, %v700_v63  ;;  %v684_v0 = vpop.f32.mrf.mxu3 }
 0x114   : > { %vm752_vm5 = vcmp.eq.f32.partialorder %v708_v9, inf  ;;  %v755_v51 = vand.u32 2147483648, %v708_v9  ;;  %vm754_vm7 = vcmp.eq.f32.partialorder %v708_v9, 0.0 }
 0x115   : > { %v624_v58 = vpop.f32.mrf.mxu0 }
 0x116   : > { %v701_v61 = vmul.f32 %v624_v58, %v624_v58  ;;  %v661_v58 = vpop.f32.mrf.mxu1 }
 0x118   : > { %v705_v1 = vadd.f32 %v701_v61, %v697_v60 }
 0x11a   : > { %1457 = vrsqrt.f32 %v705_v1  ;;  %vm716_vm1 = vcmp.eq.f32.partialorder %v705_v1, inf  ;;  %v719_v38 = vand.u32 2147483648, %v705_v1  ;;  %vm718_vm3 = vcmp.eq.f32.partialorder %v705_v1, 0.0  ;;  %v686_v2 = vpop.f32.mrf.mxu3 }
 0x11b   : > { %1459 = vrsqrt.f32 %v708_v9 }
 0x11c   : > { %1461 = vrsqrt.f32 %v707_v10 }
 0x11d   : > { %v626_v11 = vpop.f32.mrf.mxu0 }
 0x11e   : > { %v702_v13 = vmul.f32 %v626_v11, %v626_v11  ;;  %v664_v59 = vpop.f32.mrf.mxu1  ;;  %v1340_v11 = vld [vmem:[%s1950_s7 + $0x8] sm:$0xff] }
 0x11f   : > { %969 = vmatpush.bf16.msrb.mxu2 %v1340_v11 }
 0x120   : > { %v1458_v14 = vpop.eup %1457  ;;  %v706_v15 = vadd.f32 %v702_v13, %v698_v12 }
 0x121   : > { %v710_v16 = vmul.f32 %v1458_v14, %v705_v1  ;;  %v1460_v19 = vpop.eup %1459 }
 0x122   : > { %1463 = vrsqrt.f32 %v706_v15  ;;  %v1462_v20 = vpop.eup %1461  ;;  %v746_v24 = vmul.f32 %v1460_v19, %v708_v9  ;;  %vm728_vm2 = vcmp.eq.f32.partialorder %v706_v15, inf  ;;  %v731_v39 = vand.u32 2147483648, %v706_v15  ;;  %v837_v5 = vpop.f32.mrf.mxu3 }
 0x123   : > { %v711_v17 = vmul.f32 %v1458_v14, %v710_v16  ;;  %v734_v27 = vmul.f32 %v1462_v20, %v707_v10  ;;  %vm730_vm4 = vcmp.eq.f32.partialorder %v706_v15, 0.0 }
 0x124   : > { %v747_v29 = vmul.f32 %v1460_v19, %v746_v24 }
 0x125   : > { %v712_v18 = vmul.f32 0.5, %v711_v17  ;;  %v735_v32 = vmul.f32 %v1462_v20, %v734_v27 }
 0x126   : > { %v748_v34 = vmul.f32 0.5, %v747_v29  ;;  %v666_v60 = vpop.f32.mrf.mxu1 }
 0x127   : > { %v713_v21 = vsub.f32 1.5, %v712_v18  ;;  %v736_v37 = vmul.f32 0.5, %v735_v32 }
 0x128   : > { %v1464_v22 = vpop.eup %1463  ;;  %v749_v41 = vsub.f32 1.5, %v748_v34 }
 0x129   : > { %v722_v23 = vmul.f32 %v1464_v22, %v706_v15  ;;  %v714_v25 = vmul.f32 %v1458_v14, %v713_v21  ;;  %v737_v45 = vsub.f32 1.5, %v736_v37 }
 0x12a   : > { %v750_v46 = vmul.f32 %v1460_v19, %v749_v41 }
 0x12b   : > { %v723_v26 = vmul.f32 %v1464_v22, %v722_v23  ;;  %v715_v30 = vmul.f32 %v714_v25, %v705_v1  ;;  %v738_v47 = vmul.f32 %v1462_v20, %v737_v45 }
 0x12c   : > { %v751_v48 = vmul.f32 %v750_v46, %v708_v9 }
 0x12d   : > { %v724_v28 = vmul.f32 0.5, %v723_v26  ;;  %v717_v35 = vsel %vm716_vm1, %v705_v1, %v715_v30  ;;  %v739_v49 = vmul.f32 %v738_v47, %v707_v10 }
 0x12e   : > { %v720_v42 = vsel %vm718_vm3, %v719_v38, %v717_v35  ;;  %v753_v50 = vsel %vm752_vm5, %v708_v9, %v751_v48  ;;  %v669_v61 = vpop.f32.mrf.mxu1 }
 0x12f   : > { %v725_v31 = vsub.f32 1.5, %v724_v28  ;;  %v741_v52 = vsel %vm740_vm6, %v707_v10, %v739_v49  ;;  %v756_v54 = vsel %vm754_vm7, %v755_v51, %v753_v50  ;;  %1006 = vrot.lane.b32.xlu0 %v669_v61, %s1609_s23  ;;  %v839_v10 = vpop.f32.mrf.mxu3 }
 0x130   : > { %v744_v55 = vsel %vm742_vm8, %v743_v53, %v741_v52 }
 0x131   : > { %v726_v33 = vmul.f32 %v1464_v22, %v725_v31  ;;  %v768_v56 = vpack.c.bf16 %v756_v54, %v744_v55 }
 0x133   : > { %v727_v36 = vmul.f32 %v726_v33, %v706_v15 }
 0x135   : > { %v729_v40 = vsel %vm728_vm2, %v706_v15, %v727_v36  ;;  %v1339_v15 = vld [vmem:[%s1950_s7] sm:$0xff] }
 0x136   : > { %v732_v43 = vsel %vm730_vm4, %v731_v39, %v729_v40  ;;  %v671_v62 = vpop.f32.mrf.mxu1  ;;  %970 = vmatpush.bf16.msrb.mxu2 %v1339_v15 }
 0x137   : > { %v767_v44 = vpack.c.bf16 %v732_v43, %v720_v42  ;;  %1008 = vrot.lane.b32.xlu0 %v671_v62, %s1609_s23  ;;  %v842_v20 = vpop.f32.mrf.mxu3 }
 0x139   : > { %1297 = vmatmul.msk.bf16.vlgmr.msra.gmra.mxu2 %vm576_vm0, %v767_v44 }
 0x13e   : > { %v674_v63 = vpop.f32.mrf.mxu1 }
 0x13f   : > { %1010 = vrot.lane.b32.xlu1 %v674_v63, %s1609_s23  ;;  %1030 = vrot.lane.b32.xlu0 %v684_v0, %s1609_s23  ;;  %v844_v29 = vpop.f32.mrf.mxu3 }
 0x146   : > { %v676_v1 = vpop.f32.mrf.mxu1 }
 0x147   : > { %1012 = vrot.lane.b32.xlu1 %v676_v1, %s1609_s23  ;;  %988 = vrot.lane.b32.xlu0 %v661_v58, %s1609_s23 }
 0x149   : > { %1298 = vmatmul.msk.bf16.gmra.mxu2 %vm576_vm0, %v768_v56 }
 0x14e   : > { %v679_v3 = vpop.f32.mrf.mxu1 }
 0x14f   : > { %1032 = vrot.lane.b32.xlu1 %v686_v2, %s1609_s23  ;;  %1026 = vrot.lane.b32.xlu2 %v679_v3, %s1609_s23 }
 0x156   : > { %v681_v4 = vpop.f32.mrf.mxu1 }
 0x157   : > { %990 = vrot.lane.b32.xlu1 %v664_v59, %s1609_s23  ;;  %1028 = vrot.lane.b32.xlu2 %v681_v4, %s1609_s23 }
 0x15f   : > { %986 = vrot.lane.b32.xlu2 %v659_v57, %s1609_s23 }
 0x167   : > { %992 = vrot.lane.b32.xlu2 %v666_v60, %s1609_s23 }
 0x1bc   : > { %v800_v7 = vpop.f32.mrf.mxu2 }
 0x1bd   : > { %v838_v8 = vadd.f32 %v837_v5, %v800_v7 }
 0x1bf   : > { %v1865_v9 = vadd.f32 %v1455_v6, %v838_v8 }
 0x1c1   : > { %v1309_v12 = vmul.f32 -1.442695, %v1865_v9 }
 0x1c3   : > { %1465 = vpow2.f32 %v1309_v12 }
 0x1c4   : > { %v802_v13 = vpop.f32.mrf.mxu2 }
 0x1c5   : > { %v840_v14 = vadd.f32 %v839_v10, %v802_v13 }
 0x1c7   : > { %v852_v16 = vadd.f32 %v1455_v6, %v840_v14 }
 0x1c9   : > { %v1466_v17 = vpop.eup %1465  ;;  %v1310_v18 = vmul.f32 -1.442695, %v852_v16 }
 0x1ca   : > { %v867_v19 = vadd.f32 1.0, %v1466_v17 }
 0x1cb   : > { %1467 = vpow2.f32 %v1310_v18  ;;  %v1456_v18 = vld [vmem:[%s1951_s8] ss:$0 sm:$0xff] }
 0x1cc   : > { %1469 = vrcp.f32 %v867_v19  ;;  %v805_v21 = vpop.f32.mrf.mxu2  ;;  %v882_v41 = vand.u32 2147483648, %v867_v19  ;;  %vm876_vm10 = vweird.f32 %v867_v19  ;;  %v880_v42 = vand.u32 2147483647, %v867_v19 }
 0x1cd   : > { %v843_v22 = vadd.f32 %v842_v20, %v805_v21 }
 0x1ce   : > { %v883_v48 = vor.u32 1.1754944e-38, %v882_v41  ;;  %vm881_vm13 = vcmp.eq.f32.partialorder %v880_v42, 8.507059e+37 }
 0x1cf   : > { %v1875_v23 = vadd.f32 %v1455_v6, %v843_v22  ;;  %v1027_v22 = vpop.permute.xlu2 %1026 }
 0x1d1   : > { %v1468_v24 = vpop.eup %1467  ;;  %v1311_v25 = vmul.f32 -1.442695, %v1875_v23 }
 0x1d2   : > { %v1470_v26 = vpop.eup %1469  ;;  %v868_v27 = vadd.f32 1.0, %v1468_v24 }
 0x1d3   : > { %v872_v28 = vmul.f32 %v1470_v26, %v867_v19  ;;  %1471 = vpow2.f32 %v1311_v25  ;;  %vm877_vm9 = vweird.f32 %v1470_v26  ;;  %v1007_v19 = vpop.permute.xlu0 %1006 }
 0x1d4   : > { %1473 = vrcp.f32 %v868_v27  ;;  %v807_v30 = vpop.f32.mrf.mxu2  ;;  %vm878_vm11 = vmor %vm876_vm10, %vm877_vm9  ;;  %v897_v44 = vand.u32 2147483648, %v868_v27  ;;  %v895_v47 = vand.u32 2147483647, %v868_v27  ;;  %vm891_vm14 = vweird.f32 %v868_v27 }
 0x1d5   : > { %v873_v31 = vsub.f32 1.0, %v872_v28  ;;  %v845_v32 = vadd.f32 %v844_v29, %v807_v30  ;;  %vm1074_vm10 = vcmask 130048  }
 0x1d6   : > { %v898_v53 = vor.u32 1.1754944e-38, %v897_v44  ;;  %vm896_vm1 = vcmp.eq.f32.partialorder %v895_v47, 8.507059e+37 }
 0x1d7   : > { %v874_v33 = vmul.f32 %v1470_v26, %v873_v31  ;;  %v1878_v34 = vadd.f32 %v1455_v6, %v845_v32 }
 0x1d9   : > { %v1472_v35 = vpop.eup %1471  ;;  %v1312_v36 = vmul.f32 -1.442695, %v1878_v34  ;;  %v875_v39 = vadd.f32 %v1470_v26, %v874_v33 }
 0x1da   : > { %v1474_v37 = vpop.eup %1473  ;;  %v869_v38 = vadd.f32 1.0, %v1472_v35 }
 0x1db   : > { %v887_v40 = vmul.f32 %v1474_v37, %v868_v27  ;;  %1475 = vpow2.f32 %v1312_v36  ;;  %v879_v45 = vsel %vm878_vm11, %v1470_v26, %v875_v39  ;;  %vm892_vm12 = vweird.f32 %v1474_v37  ;;  %v1009_v28 = vpop.permute.xlu0 %1008 }
 0x1dc   : > { %1477 = vrcp.f32 %v869_v38  ;;  %v884_v52 = vsel %vm881_vm13, %v883_v48, %v879_v45  ;;  %vm893_vm15 = vmor %vm891_vm14, %vm892_vm12  ;;  %v912_v2 = vand.u32 2147483648, %v869_v38  ;;  %vm906_vm3 = vweird.f32 %v869_v38 }
 0x1dd   : > { %v888_v43 = vsub.f32 1.0, %v887_v40  ;;  %v931_v58 = vmul.f32 %v884_v52, %v1865_v9  ;;  %v910_v3 = vand.u32 2147483647, %v869_v38  ;;  %vm1083_vm11 = vcmask 392192  }
 0x1de   : > { %v913_v9 = vor.u32 1.1754944e-38, %v912_v2  ;;  %vm1088_vm12 = vcmask 523264  }
 0x1df   : > { %v889_v46 = vmul.f32 %v1474_v37, %v888_v43  ;;  %vm911_vm6 = vcmp.eq.f32.partialorder %v910_v3, 8.507059e+37 }
 0x1e1   : > { %v1476_v49 = vpop.eup %1475  ;;  %v890_v50 = vadd.f32 %v1474_v37, %v889_v46 }
 0x1e2   : > { %v1478_v51 = vpop.eup %1477  ;;  %v870_v54 = vadd.f32 1.0, %v1476_v49 }
 0x1e3   : > { %v894_v55 = vsel %vm893_vm15, %v1474_v37, %v890_v50  ;;  %v902_v56 = vmul.f32 %v1478_v51, %v869_v38  ;;  %vm907_vm2 = vweird.f32 %v1478_v51  ;;  %v1029_v37 = vpop.permute.xlu2 %1028  ;;  %v1031_v41 = vpop.permute.xlu0 %1030 }
 0x1e4   : > { %v899_v57 = vsel %vm896_vm1, %v898_v53, %v894_v55  ;;  %1479 = vrcp.f32 %v870_v54  ;;  %vm908_vm4 = vmor %vm906_vm3, %vm907_vm2  ;;  %v927_v5 = vand.u32 2147483648, %v870_v54  ;;  %v925_v8 = vand.u32 2147483647, %v870_v54 }
 0x1e5   : > { %v932_v59 = vmul.f32 %v899_v57, %v852_v16  ;;  %v903_v60 = vsub.f32 1.0, %v902_v56  ;;  %vm921_vm7 = vweird.f32 %v870_v54 }
 0x1e6   : > { %v928_v12 = vor.u32 1.1754944e-38, %v927_v5  ;;  %vm926_vm9 = vcmp.eq.f32.partialorder %v925_v8, 8.507059e+37 }
 0x1e7   : > { %v935_v61 = vpack.c.bf16 %v932_v59, %v931_v58  ;;  %v904_v62 = vmul.f32 %v1478_v51, %v903_v60 }
 0x1e9   : > { %1321 = vmatmul.msk.bf16.vlgmr.msrb.gmra.mxu2 %vm576_vm0, %v935_v61  ;;  %v905_v0 = vadd.f32 %v1478_v51, %v904_v62 }
 0x1ea   : > { %v1480_v63 = vpop.eup %1479 }
 0x1eb   : > { %v917_v1 = vmul.f32 %v1480_v63, %v870_v54  ;;  %v909_v6 = vsel %vm908_vm4, %v1478_v51, %v905_v0  ;;  %vm922_vm5 = vweird.f32 %v1480_v63  ;;  %v987_v43 = vpop.permute.xlu2 %986  ;;  %v989_v45 = vpop.permute.xlu0 %988 }
 0x1ec   : > { %v914_v11 = vsel %vm911_vm6, %v913_v9, %v909_v6  ;;  %vm923_vm8 = vmor %vm921_vm7, %vm922_vm5 }
 0x1ed   : > { %v918_v4 = vsub.f32 1.0, %v917_v1  ;;  %v933_v15 = vmul.f32 %v914_v11, %v1875_v23  ;;  %v1011_v23 = vpop.permute.xlu1 %1010 }
 0x1ef   : > { %v919_v7 = vmul.f32 %v1480_v63, %v918_v4 }
 0x1f1   : > { %v920_v10 = vadd.f32 %v1480_v63, %v919_v7 }
 0x1f3   : > { %v924_v13 = vsel %vm923_vm8, %v1480_v63, %v920_v10  ;;  %v993_v44 = vpop.permute.xlu2 %992 }
 0x1f4   : > { %v929_v14 = vsel %vm926_vm9, %v928_v12, %v924_v13 }
 0x1f5   : > { %v934_v16 = vmul.f32 %v929_v14, %v1878_v34  ;;  %v1013_v30 = vpop.permute.xlu1 %1012 }
 0x1f7   : > { %v936_v17 = vpack.c.bf16 %v934_v16, %v933_v15 }
 0x1f9   : > { %1322 = vmatmul.msk.bf16.gmra.mxu2 %vm576_vm0, %v936_v17 }
 0x1fd   : > { %v1033_v36 = vpop.permute.xlu1 %1032 }
 0x205   : > { %v991_v46 = vpop.permute.xlu1 %990 }
 0x26c   : > { %v972_v20 = vpop.f32.mrf.mxu2 }
 0x26d   : > { %v973_v21 = vadd.f32 %v1456_v18, %v972_v20 }
 0x26f   : > { %v1038_v24 = vmul.f32 %v1027_v22, %v973_v21  ;;  %v1018_v25 = vmul.f32 %v1007_v19, %v973_v21  ;;  %v998_v47 = vmul.f32 %v987_v43, %v973_v21 }
 0x271   : > { %1062 = vrot.lane.b32.xlu1 %v1038_v24, %s1610_s18  ;;  %1046 = vrot.lane.b32.xlu0 %v1018_v25, %s1609_s23  ;;  %v1075_v51 = vsel %vm1074_vm10, %v973_v21, %v998_v47 }
 0x274   : > { %v974_v26 = vpop.f32.mrf.mxu2 }
 0x275   : > { %v975_v27 = vadd.f32 %v1456_v18, %v974_v26 }
 0x277   : > { %v1019_v29 = vmul.f32 %v1009_v28, %v975_v27  ;;  %v1039_v40 = vmul.f32 %v1029_v37, %v975_v27  ;;  %v999_v55 = vmul.f32 %v989_v45, %v975_v27 }
 0x279   : > { %1048 = vrot.lane.b32.xlu1 %v1019_v29, %s1609_s23  ;;  %v1076_v56 = vsel %vm1074_vm10, %v975_v27, %v999_v55 }
 0x27c   : > { %v977_v31 = vpop.f32.mrf.mxu2 }
 0x27d   : > { %v978_v32 = vadd.f32 %v1456_v18, %v977_v31 }
 0x27f   : > { %v1020_v33 = vmul.f32 %v1011_v23, %v978_v32  ;;  %v1040_v42 = vmul.f32 %v1031_v41, %v978_v32  ;;  %v1000_v4 = vmul.f32 %v991_v46, %v978_v32 }
 0x281   : > { %1050 = vrot.lane.b32.xlu2 %v1020_v33, %s1609_s23  ;;  %v1077_v6 = vsel %vm1074_vm10, %v978_v32, %v1000_v4 }
 0x284   : > { %v979_v34 = vpop.f32.mrf.mxu2 }
 0x285   : > { %v980_v35 = vadd.f32 %v1456_v18, %v979_v34 }
 0x287   : > { %v1041_v38 = vmul.f32 %v1033_v36, %v980_v35  ;;  %v1021_v39 = vmul.f32 %v1013_v30, %v980_v35  ;;  %v1001_v62 = vmul.f32 %v993_v44, %v980_v35 }
 0x289   : > { %1068 = vrot.lane.b32.xlu1 %v1041_v38, %s1610_s18  ;;  %1052 = vrot.lane.b32.xlu0 %v1021_v39, %s1609_s23  ;;  %v1078_v1 = vsel %vm1074_vm10, %v980_v35, %v1001_v62 }
 0x28a   : > { %1064 = vrot.lane.b32.xlu2 %v1039_v40, %s1610_s18 }
 0x291   : > { %1066 = vrot.lane.b32.xlu0 %v1040_v42, %s1610_s18 }
 0x2db   : > { %v1051_v48 = vpop.permute.xlu2 %1050 }
 0x2dc   : > { %v1081_v7 = vsel %vm576_vm0, %v1077_v6, %v1051_v48 }
 0x2e3   : > { %v1063_v49 = vpop.permute.xlu1 %1062  ;;  %v1047_v50 = vpop.permute.xlu0 %1046 }
 0x2e4   : > { %v1079_v52 = vsel %vm576_vm0, %v1075_v51, %v1047_v50  ;;  %v1065_v58 = vpop.permute.xlu2 %1064 }
 0x2e5   : > { %v1084_v53 = vsel %vm1083_vm11, %v1079_v52, %v1063_v49 }
 0x2e6   : > { %v1089_v54 = vsel %vm1088_vm12, %v1084_v53, 0.0 }
 0x2e7   : > { %1093 = vst [vmem:[%s520_s29] sm:$0xff] %v1089_v54 }
 0x2eb   : > { %v1049_v57 = vpop.permute.xlu1 %1048 }
 0x2ec   : > { %v1080_v59 = vsel %vm576_vm0, %v1076_v56, %v1049_v57 }
 0x2ed   : > { %v1085_v60 = vsel %vm1083_vm11, %v1080_v59, %v1065_v58 }
 0x2ee   : > { %v1090_v61 = vsel %vm1088_vm12, %v1085_v60, 0.0 }
 0x2ef   : > { %1094 = vst [vmem:[%s520_s29 + $0x8] sm:$0xff] %v1090_v61 }
 0x2fb   : > { %v1069_v63 = vpop.permute.xlu1 %1068  ;;  %v1053_v0 = vpop.permute.xlu0 %1052 }
 0x2fc   : > { %v1082_v2 = vsel %vm576_vm0, %v1078_v1, %v1053_v0 }
 0x2fd   : > { %v1087_v3 = vsel %vm1083_vm11, %v1082_v2, %v1069_v63 }
 0x2fe   : > { %v1092_v5 = vsel %vm1088_vm12, %v1087_v3, 0.0 }
 0x2ff   : > { %1096 = vst [vmem:[%s520_s29 + $0x18] sm:$0xff] %v1092_v5 }
 0x303   : > { %v1067_v8 = vpop.permute.xlu0 %1066 }
 0x304   : > { %v1086_v9 = vsel %vm1083_vm11, %v1081_v7, %v1067_v8 }
 0x305   : > { %v1091_v10 = vsel %vm1088_vm12, %v1086_v9, 0.0 }
 0x306   : > { %1095 = vst [vmem:[%s520_s29 + $0x10] sm:$0xff] %v1091_v10 }
 0x307   : > { %1508 = shalt.err (!%p1505_p3)
}
 0x308   : > { %s1611_s16 = smov 128   ;;  %s1612_s29 = smov 8  }
 0x309   : > { %1348 = dma.vmem_to_hbm [thread:$0]  (%p1702_p6), %s1111_s21, 512, %s1113_s13, %s1098_s1, %s1611_s16, %s1611_s16, %s1612_s29  }
 0x30a PF: > { %s1127_s26 = sand.u32 1, %s1563_s30   ;;  %p1351_p4 = pnand %p1243_p9, %p1706_p8 }
 0x30b   : > { %s1128_s25 = scalar_lea.sflag [#allocation4], %s1127_s26 }
 0x30c   : > { %p1352_p5 = pneg %p1351_p4 }
 0x30e   : > { %1558 = dma.done.wait (%p1352_p5), %s1128_s25, 512  }
 0x30f   : > { %1560 = vsyncadd (%p1352_p5), %s1128_s25, 4294966784  ;;  %s1966_s23 = sld [smem:[#allocation6_spill]]  ;;  %p19_p7 = scmp.ge.s32.totalorder %s1688_s15, 4  }
 0x310   : > { %s1967_s11 = sld [smem:[#allocation7_spill]]  ;;  %s1968_s30 = smov %s1567_s10 }
 0x311   : > { %s1970_s12 = smov %s1688_s15  ;;  %21 = sbr.rel (!%p19_p7) target bundleno = 5 (0x5), region = 181 }
 0x315   : > { %s1969_s10 = smov %s1966_s23 }
 0x316   :  { %1134 = vsyncpa [#allocation4], 1 }
 0x317   :  { %1136 = vsyncpa [#allocation4 + $0x1], 1 }

</bundles_post_ra>
